<compile_context>
chip_gen: v7x
topology: tpu7x:2x2x1
jax: 0.10.0
libtpu: 0.0.40
codegen_flags: <defaults>
</compile_context>

<pallas_src>
import jax
import jax.numpy as jnp
from jax import lax
from jax.experimental import pallas as pl
from jax.experimental.pallas import tpu as pltpu

LANE = 128


def _round_up(v, m):
    return (v + m - 1) // m * m


# ----------------------------------------------------------------------------
# Pass 1 kernel: branch convs + fused BN + LeakyReLU + pooled channel sums
# ----------------------------------------------------------------------------
def make_branch_kernel(M, G_eff, Cin_g, Cout_g, Cp, P, Ht, W, Wp):
    L = Ht * Wp

    def kernel(*refs):
        x_ref = refs[0]                       # (1, 1, BAND, Cp) bf16 halo'd row band
        w_refs = refs[1:1 + M]                # branch i: (k_i*k_i*G_eff, Cin_g, Cout_g)
        scale_ref = refs[1 + M]               # (M, 1, Cp) f32 fused BN scale
        bias_ref = refs[2 + M]                # (M, 1, Cp) f32 fused conv-bias + BN bias
        feas_ref = refs[3 + M]                # (1, 1, M*L, Cp) bf16 branch features
        pool_ref = refs[4 + M]                # (1, 1, Cp) f32 pooled channel sums

        t = pl.program_id(1)

        # Columns c >= W of each Wp-wide row are wrap-around garbage of the
        # flattened-band formulation: exclude them from the global average pool.
        col = lax.broadcasted_iota(jnp.int32, (L, 1), 0) % Wp
        valid = col < W

        @pl.when(t == 0)
        def _():
            pool_ref[...] = jnp.zeros((1, 1, Cp), jnp.float32)

        pool_acc = jnp.zeros((1, Cp), jnp.float32)
        for i in range(M):
            k = 1 + 2 * i
            parts = []
            for g in range(G_eff):
                acc = jnp.zeros((L, Cout_g), jnp.float32)
                for dy in range(k):
                    for dx in range(k):
                        # Contiguous slice of the flattened band: position r*Wp + c
                        # reads padded pixel (r + P - i + dy, c + P - i + dx).
                        off = (P - i + dy) * Wp + (P - i + dx)
                        win = x_ref[0, 0, off:off + L,
                                    g * Cin_g:(g + 1) * Cin_g]
                        tap = w_refs[i][(dy * k + dx) * G_eff + g]
                        acc = acc + jnp.dot(win, tap,
                                            preferred_element_type=jnp.float32)
                parts.append(acc)
            y = parts[0] if G_eff == 1 else jnp.concatenate(parts, axis=-1)
            y = y * scale_ref[i] + bias_ref[i]           # fused conv bias + BN
            y = jnp.maximum(y, 0.2 * y)                  # LeakyReLU(0.2)
            feas_ref[0, 0, i * L:(i + 1) * L, :] = y.astype(feas_ref.dtype)
            pool_acc = pool_acc + jnp.sum(jnp.where(valid, y, 0.0),
                                          axis=0, keepdims=True)

        pool_ref[0] = pool_ref[0] + pool_acc

    return kernel


# ----------------------------------------------------------------------------
# Pass 2 kernel: squeeze/excitation FCs + branch softmax + attention apply
# ----------------------------------------------------------------------------
def make_attention_kernel(M, Cp, H, W, Ht, Wp):
    L = Ht * Wp
    inv_hw = 1.0 / float(H * W)

    def kernel(feas_ref, pool_ref, wfc_ref, bfc_ref, wfcs_ref, bfcs_ref, o_ref):
        fea_s = pool_ref[0] * inv_hw                                   # (1, Cp)
        fea_z = jnp.dot(fea_s, wfc_ref[...],
                        preferred_element_type=jnp.float32) + bfc_ref[...]   # (1, dp)
        logits = jnp.concatenate(
            [jnp.dot(fea_z, wfcs_ref[i],
                     preferred_element_type=jnp.float32) + bfcs_ref[i]
             for i in range(M)], axis=0)                               # (M, Cp)

        m = jnp.max(logits, axis=0, keepdims=True)
        e = jnp.exp(logits - m)
        att = e * pl.reciprocal(jnp.sum(e, axis=0, keepdims=True), approx=True)

        acc = feas_ref[0, 0, 0:L, :].astype(jnp.float32) * att[0:1, :]
        for i in range(1, M):
            acc = acc + (feas_ref[0, 0, i * L:(i + 1) * L, :].astype(jnp.float32)
                         * att[i:i + 1, :])
        o_ref[0, 0] = acc.astype(o_ref.dtype)

    return kernel


# ----------------------------------------------------------------------------
# Weight preparation
# ----------------------------------------------------------------------------
def make_dense_grouped_weight(w, G):
    """(C_out, C_in/G, k, k) grouped conv weight -> dense (k, k, C_in, C_out)."""
    C_out, Cg, k, _ = w.shape
    C_in = Cg * G
    Cog = C_out // G
    dense = jnp.zeros((k, k, C_in, C_out), dtype=w.dtype)
    for g in range(G):
        block = w[g * Cog:(g + 1) * Cog]             # (Cog, Cg, k, k)
        block = jnp.transpose(block, (2, 3, 1, 0))   # (k, k, Cg, Cog)
        dense = dense.at[:, :, g * Cg:(g + 1) * Cg,
                         g * Cog:(g + 1) * Cog].set(block)
    return dense


def _prep_branch_weight(w, G, use_grouped, Cp):
    """torch grouped OIHW -> (k*k*G_eff, Cin_g, Cout_g) bf16."""
    C_out, Cg, k, _ = w.shape
    if use_grouped:
        Cog = C_out // G
        blocks = [jnp.transpose(w[g * Cog:(g + 1) * Cog], (2, 3, 1, 0))
                  for g in range(G)]                     # each (k, k, Cg, Cog)
        wk = jnp.stack(blocks, axis=2)                   # (k, k, G, Cg, Cog)
    else:
        dense = make_dense_grouped_weight(w, G)          # (k, k, C, C)
        dense = jnp.pad(dense, ((0, 0), (0, 0),
                                (0, Cp - C_out), (0, Cp - C_out)))
        wk = dense[:, :, None, :, :]                     # (k, k, 1, Cp, Cp)
    kk, _, ge, cin, cout = wk.shape
    return wk.reshape(kk * kk * ge, cin, cout).astype(jnp.bfloat16)


# ----------------------------------------------------------------------------
# Wrapper: parameter prep + two pallas_call passes
# ----------------------------------------------------------------------------
def skconv_pallas(x_nchw, params, M, G, *, row_tile=None):
    N, C, H, W = x_nchw.shape
    P = M - 1
    d = params["wfc"].shape[1]
    eps = 1e-5

    # ---- lane padding / grouping decision ----
    use_grouped = (C % G == 0) and ((C // G) % LANE == 0)
    if use_grouped:
        Cp, G_eff = C, G
        Cin_g = Cout_g = C // G
    else:
        Cp, G_eff = _round_up(C, LANE), 1
        Cin_g = Cout_g = Cp
    dp = _round_up(d, LANE)

    # ---- spatial row tiling (bounds VMEM independent of image size) ----
    if row_tile is None:
        row_tile = min(H, 32)
        while H % row_tile != 0:
            row_tile -= 1
    assert H % row_tile == 0, "row_tile must divide H"
    Ht = row_tile
    T = H // Ht
    Hp, Wp = H + 2 * P, W + 2 * P
    Hb = Ht + 2 * P
    L = Ht * Wp
    TAIL = 2 * P                 # guard so every tap's contiguous slice stays in-bounds
    BAND = Hb * Wp + TAIL

    # ---- input prep: NCHW -> padded NHWC -> flattened, halo'd bf16 row bands ----
    x = jnp.transpose(x_nchw, (0, 2, 3, 1))
    x = jnp.pad(x, ((0, 0), (P, P), (P, P), (0, Cp - C)))
    x_flat = x.reshape(N, Hp * Wp, Cp).astype(jnp.bfloat16)
    bands = [jnp.pad(x_flat[:, t * Ht * Wp:(t * Ht + Hb) * Wp, :],
                     ((0, 0), (0, TAIL), (0, 0))) for t in range(T)]
    x_bands = jnp.stack(bands, axis=1)                    # (N, T, BAND, Cp)

    # ---- params: bf16 conv weights, fused BN scale/bias, lane-padded FCs ----
    w_list = [_prep_branch_weight(params["conv_w"][i], G, use_grouped, Cp)
              for i in range(M)]
    s = params["bn_gamma"] / jnp.sqrt(params["bn_var"] + eps)          # (M, C)
    fused_scale = jnp.pad(s, ((0, 0), (0, Cp - C))).reshape(M, 1, Cp)
    fused_bias = jnp.pad((params["conv_b"] - params["bn_mean"]) * s
                         + params["bn_beta"],
                         ((0, 0), (0, Cp - C))).reshape(M, 1, Cp)
    wfc_p = jnp.pad(params["wfc"], ((0, Cp - C), (0, dp - d)))
    bfc_p = jnp.pad(params["bfc"], (0, dp - d)).reshape(1, dp)
    wfcs_p = jnp.pad(params["wfcs"], ((0, 0), (0, dp - d), (0, Cp - C)))
    bfcs_p = jnp.pad(params["bfcs"], ((0, 0), (0, Cp - C))).reshape(M, 1, Cp)

    # ---- VMEM budget sized from the chosen tiles, with headroom ----
    est = (2 * BAND * Cp * 2                      # double-buffered input band
           + 2 * (M * L * Cp * 2 + Cp * 4)        # double-buffered feas + pool blocks
           + 2 * L * Cp * 4                       # double-buffered pass-2 output block
           + 2 * sum(int(w.size) * 2 for w in w_list)
           + 2 * (2 * M * Cp + Cp * dp + dp + M * dp * Cp + M * Cp) * 4
           + (G_eff + 2) * L * max(Cout_g, Cp) * 4)   # in-kernel f32 accumulators
    vmem_limit = int(min(64 * 2 ** 20, max(32 * 2 ** 20, 4 * est)))

    # ---- pass 1: branch convs + pooled sums ----
    kernel1 = make_branch_kernel(M, G_eff, Cin_g, Cout_g, Cp, P, Ht, W, Wp)
    in_specs1 = [pl.BlockSpec((1, 1, BAND, Cp), lambda n, t: (n, t, 0, 0))]
    in_specs1 += [pl.BlockSpec(w.shape, lambda n, t: (0, 0, 0)) for w in w_list]
    in_specs1 += [pl.BlockSpec((M, 1, Cp), lambda n, t: (0, 0, 0)),
                  pl.BlockSpec((M, 1, Cp), lambda n, t: (0, 0, 0))]
    feas, pool = pl.pallas_call(
        kernel1,
        out_shape=(jax.ShapeDtypeStruct((N, T, M * L, Cp), jnp.bfloat16),
                   jax.ShapeDtypeStruct((N, 1, Cp), jnp.float32)),
        grid_spec=pltpu.PrefetchScalarGridSpec(
            num_scalar_prefetch=0,
            grid=(N, T),
            in_specs=in_specs1,
            out_specs=[pl.BlockSpec((1, 1, M * L, Cp), lambda n, t: (n, t, 0, 0)),
                       pl.BlockSpec((1, 1, Cp), lambda n, t: (n, 0, 0))]),
        compiler_params=pltpu.CompilerParams(
            dimension_semantics=("parallel", "arbitrary"),
            vmem_limit_bytes=vmem_limit),
    )(x_bands, *w_list, fused_scale, fused_bias)

    # ---- pass 2: attention + weighted sum ----
    kernel2 = make_attention_kernel(M, Cp, H, W, Ht, Wp)
    out_flat = pl.pallas_call(
        kernel2,
        out_shape=jax.ShapeDtypeStruct((N, T, L, Cp), x_nchw.dtype),
        grid_spec=pltpu.PrefetchScalarGridSpec(
            num_scalar_prefetch=0,
            grid=(N, T),
            in_specs=[pl.BlockSpec((1, 1, M * L, Cp), lambda n, t: (n, t, 0, 0)),
                      pl.BlockSpec((1, 1, Cp), lambda n, t: (n, 0, 0)),
                      pl.BlockSpec((Cp, dp), lambda n, t: (0, 0)),
                      pl.BlockSpec((1, dp), lambda n, t: (0, 0)),
                      pl.BlockSpec((M, dp, Cp), lambda n, t: (0, 0, 0)),
                      pl.BlockSpec((M, 1, Cp), lambda n, t: (0, 0, 0))],
            out_specs=pl.BlockSpec((1, 1, L, Cp), lambda n, t: (n, t, 0, 0))),
        compiler_params=pltpu.CompilerParams(
            dimension_semantics=("parallel", "parallel"),
            vmem_limit_bytes=vmem_limit),
    )(feas, pool, wfc_p, bfc_p, wfcs_p, bfcs_p)

    # ---- strip width/lane padding, back to NCHW ----
    out = out_flat.reshape(N, H, Wp, Cp)[:, :, :W, :C]
    return jnp.transpose(out, (0, 3, 1, 2))


# ----------------------------------------------------------------------------
# Deterministic parameter init (shapes dictated by the module's __init__)
# ----------------------------------------------------------------------------
def init_params(key, features, M, G, r, L):
    d = max(features // r, L)
    Cg = features // G
    ks = [1 + 2 * i for i in range(M)]
    keys = jax.random.split(key, M + 9)
    conv_w = [0.3 * jax.random.normal(keys[i], (features, Cg, ks[i], ks[i]), jnp.float32)
              for i in range(M)]
    conv_b = 0.1 * jax.random.normal(keys[M + 0], (M, features), jnp.float32)
    bn_gamma = 1.0 + 0.1 * jax.random.normal(keys[M + 1], (M, features), jnp.float32)
    bn_beta = 0.1 * jax.random.normal(keys[M + 2], (M, features), jnp.float32)
    bn_mean = 0.05 * jax.random.normal(keys[M + 3], (M, features), jnp.float32)
    bn_var = jnp.abs(1.0 + 0.1 * jax.random.normal(keys[M + 4], (M, features), jnp.float32))
    wfc = 0.3 * jax.random.normal(keys[M + 5], (features, d), jnp.float32)
    bfc = 0.1 * jax.random.normal(keys[M + 6], (d,), jnp.float32)
    wfcs = 0.3 * jax.random.normal(keys[M + 7], (M, d, features), jnp.float32)
    bfcs = 0.1 * jax.random.normal(keys[M + 8], (M, features), jnp.float32)
    return dict(conv_w=conv_w, conv_b=conv_b,
                bn_gamma=bn_gamma, bn_beta=bn_beta, bn_mean=bn_mean, bn_var=bn_var,
                wfc=wfc, bfc=bfc, wfcs=wfcs, bfcs=bfcs)


# ----------------------------------------------------------------------------
# Pure-JAX reference (mirrors the PyTorch forward, BN in inference mode)
# ----------------------------------------------------------------------------
def skconv_ref(x, params, M, G):
    eps = 1e-5
    fea_list = []
    for i in range(M):
        out = lax.conv_general_dilated(
            x, params["conv_w"][i], window_strides=(1, 1),
            padding=[(i, i), (i, i)], feature_group_count=G,
            dimension_numbers=("NCHW", "OIHW", "NCHW"))
        out = out + params["conv_b"][i][None, :, None, None]
        s = params["bn_gamma"][i] / jnp.sqrt(params["bn_var"][i] + eps)
        out = ((out - params["bn_mean"][i][None, :, None, None])
               * s[None, :, None, None] + params["bn_beta"][i][None, :, None, None])
        out = jnp.where(out > 0, out, 0.2 * out)
        fea_list.append(out)
    feas = jnp.stack(fea_list, axis=1)                          # (N, M, C, H, W)
    fea_U = feas.sum(axis=1)
    fea_s = fea_U.mean(axis=(-1, -2))                           # (N, C)
    fea_z = fea_s @ params["wfc"] + params["bfc"]               # (N, d)
    logits = jnp.stack([fea_z @ params["wfcs"][i] + params["bfcs"][i]
                        for i in range(M)], axis=1)             # (N, M, C)
    att = jax.nn.softmax(logits, axis=1)
    return (feas * att[..., None, None]).sum(axis=1)            # (N, C, H, W)


# ----------------------------------------------------------------------------
if __name__ == "__main__":
    features, M, G, r, L_min = 8, 2, 2, 2, 4       # d = max(8 // 2, 4) = 4
    N, H, W = 2, 16, 16

    key = jax.random.PRNGKey(0)
    kx, kp = jax.random.split(key)
    x = jax.random.normal(kx, (N, features, H, W), jnp.float32)
    params = init_params(kp, features, M, G, r, L_min)

    out = skconv_pallas(x, params, M, G, row_tile=8)    # 2 row tiles per image
    out = jax.block_until_ready(out)

    ref = skconv_ref(x, params, M, G)
    assert out.shape == ref.shape == (N, features, H, W)
    err = float(jnp.max(jnp.abs(out - ref)))
    scale = float(jnp.max(jnp.abs(ref)))
    # bf16 conv inputs + bf16-stored branch features => loose tolerance vs f32 ref
    assert err <= 5e-2 * max(1.0, scale), f"max abs err = {err} (ref max = {scale})"
    print("KERNEL_OK")
</pallas_src>

<mosaic_0001>
module attributes {stable_mosaic.version = 11 : i64} {
  func.func @kernel(%arg0: i32, %arg1: i32, %arg2: memref<1x1x182x128xbf16, #tpu.memory_space<vmem>>, %arg3: memref<1x128x128xbf16, #tpu.memory_space<vmem>>, %arg4: memref<9x128x128xbf16, #tpu.memory_space<vmem>>, %arg5: memref<2x1x128xf32, #tpu.memory_space<vmem>>, %arg6: memref<2x1x128xf32, #tpu.memory_space<vmem>>, %arg7: memref<1x1x288x128xbf16, #tpu.memory_space<vmem>>, %arg8: memref<1x1x128xf32, #tpu.memory_space<vmem>>) attributes {dimension_semantics = [#tpu.dimension_semantics<parallel>, #tpu.dimension_semantics<arbitrary>], iteration_bounds = array<i64: 2, 2>, scalar_prefetch = 0 : i64, scratch_operands = 0 : i64, tpu.core_type = #tpu.core_type<tc>, window_params = [{transform_indices = @transform_0, window_bounds = array<i64: 1, 1, 182, 128>}, {pipeline_mode = #tpu.pipeline_mode<synchronous>, transform_indices = @transform_1, window_bounds = array<i64: 1, 128, 128>}, {pipeline_mode = #tpu.pipeline_mode<synchronous>, transform_indices = @transform_2, window_bounds = array<i64: 9, 128, 128>}, {pipeline_mode = #tpu.pipeline_mode<synchronous>, transform_indices = @transform_3, window_bounds = array<i64: 2, 1, 128>}, {pipeline_mode = #tpu.pipeline_mode<synchronous>, transform_indices = @transform_4, window_bounds = array<i64: 2, 1, 128>}, {transform_indices = @transform_5, window_bounds = array<i64: 1, 1, 288, 128>}, {transform_indices = @transform_6, window_bounds = array<i64: 1, 1, 128>}]} {
    %0 = tpu.iota {dimensions = array<i32: 0>} : vector<144x1xi32>
    %c18_i32 = arith.constant 18 : i32
    %c0_i32 = arith.constant 0 : i32
    %1 = arith.cmpi eq, %c18_i32, %c0_i32 : i32
    %c1_i32 = arith.constant 1 : i32
    %2 = arith.select %1, %c1_i32, %c18_i32 : i32
    %3 = vector.broadcast %2 : i32 to vector<144x1xi32>
    %4 = arith.remsi %0, %3 : vector<144x1xi32>
    %c0_i32_0 = arith.constant 0 : i32
    %5 = vector.broadcast %c0_i32_0 : i32 to vector<144x1xi32>
    %6 = arith.cmpi ne, %4, %5 : vector<144x1xi32>
    %c0_i32_1 = arith.constant 0 : i32
    %7 = vector.broadcast %c0_i32_1 : i32 to vector<144x1xi32>
    %8 = arith.cmpi slt, %4, %7 : vector<144x1xi32>
    %c0_i32_2 = arith.constant 0 : i32
    %9 = arith.cmpi slt, %2, %c0_i32_2 : i32
    %10 = vector.broadcast %9 : i1 to vector<144x1xi1>
    %11 = vector.broadcast %10 : vector<144x1xi1> to vector<144x1xi1>
    %12 = arith.xori %8, %11 : vector<144x1xi1>
    %13 = arith.andi %12, %6 : vector<144x1xi1>
    %14 = vector.broadcast %2 : i32 to vector<144x1xi32>
    %15 = arith.addi %4, %14 : vector<144x1xi32>
    %16 = arith.select %13, %15, %4 : vector<144x1xi1>, vector<144x1xi32>
    %c16_i32 = arith.constant 16 : i32
    %17 = vector.broadcast %c16_i32 : i32 to vector<144x1xi32>
    %18 = arith.cmpi slt, %16, %17 : vector<144x1xi32>
    %c0_i32_3 = arith.constant 0 : i32
    %19 = arith.cmpi eq, %arg1, %c0_i32_3 : i32
    %20 = arith.extui %19 : i1 to i32
    %c0_i32_4 = arith.constant 0 : i32
    %21 = arith.cmpi ne, %20, %c0_i32_4 : i32
    scf.if %21 {
      %cst_103 = arith.constant 0.000000e+00 : f32
      %135 = vector.broadcast %cst_103 : f32 to vector<1x1x128xf32>
      %c0_104 = arith.constant 0 : index
      %c0_105 = arith.constant 0 : index
      %c0_106 = arith.constant 0 : index
      %136 = vector.load %arg8[%c0_104, %c0_105, %c0_106] : memref<1x1x128xf32, #tpu.memory_space<vmem>>, vector<1x1x128xf32>
      tpu.vector_store %arg8[%c0_104, %c0_105, %c0_106], %135 {strides = array<i32>} : memref<1x1x128xf32, #tpu.memory_space<vmem>>, vector<1x1x128xf32>,
    } else {
    }
    %cst = arith.constant 0.000000e+00 : f32
    %22 = vector.broadcast %cst : f32 to vector<1x128xf32>
    %cst_5 = arith.constant 0.000000e+00 : f32
    %23 = vector.broadcast %cst_5 : f32 to vector<144x128xf32>
    %c0 = arith.constant 0 : index
    %c0_6 = arith.constant 0 : index
    %c19 = arith.constant 19 : index
    %c0_7 = arith.constant 0 : index
    %24 = vector.load %arg2[%c0, %c0_6, %c19, %c0_7] : memref<1x1x182x128xbf16, #tpu.memory_space<vmem>>, vector<1x1x144x128xbf16>
    %25 = vector.shape_cast %24 : vector<1x1x144x128xbf16> to vector<144x128xbf16>
    %c0_8 = arith.constant 0 : index
    %c0_9 = arith.constant 0 : index
    %c0_10 = arith.constant 0 : index
    %26 = vector.load %arg3[%c0_8, %c0_9, %c0_10] : memref<1x128x128xbf16, #tpu.memory_space<vmem>>, vector<1x128x128xbf16>
    %27 = vector.shape_cast %26 : vector<1x128x128xbf16> to vector<128x128xbf16>
    %cst_11 = arith.constant dense<0.000000e+00> : vector<144x128xf32>
    %28 = tpu.matmul %25, %27, %cst_11 {dimension_numbers = #tpu.dot_dimension_numbers<[1], [0], [0], [1], [0, 0, 1, 1], [], []>} : vector<144x128xbf16>, vector<128x128xbf16>, vector<144x128xf32> -> vector<144x128xf32>
    %29 = arith.addf %23, %28 : vector<144x128xf32>
    %c0_12 = arith.constant 0 : index
    %c0_13 = arith.constant 0 : index
    %c0_14 = arith.constant 0 : index
    %30 = vector.load %arg5[%c0_12, %c0_13, %c0_14] : memref<2x1x128xf32, #tpu.memory_space<vmem>>, vector<1x1x128xf32>
    %31 = vector.shape_cast %30 : vector<1x1x128xf32> to vector<1x128xf32>
    %32 = vector.broadcast %31 : vector<1x128xf32> to vector<144x128xf32>
    %33 = arith.mulf %29, %32 : vector<144x128xf32>
    %c0_15 = arith.constant 0 : index
    %c0_16 = arith.constant 0 : index
    %c0_17 = arith.constant 0 : index
    %34 = vector.load %arg6[%c0_15, %c0_16, %c0_17] : memref<2x1x128xf32, #tpu.memory_space<vmem>>, vector<1x1x128xf32>
    %35 = vector.shape_cast %34 : vector<1x1x128xf32> to vector<1x128xf32>
    %36 = vector.broadcast %35 : vector<1x128xf32> to vector<144x128xf32>
    %37 = arith.addf %33, %36 : vector<144x128xf32>
    %cst_18 = arith.constant 2.000000e-01 : f32
    %38 = vector.broadcast %cst_18 : f32 to vector<144x128xf32>
    %39 = arith.mulf %38, %37 : vector<144x128xf32>
    %40 = arith.maximumf %37, %39 : vector<144x128xf32>
    %41 = arith.truncf %40 : vector<144x128xf32> to vector<144x128xbf16>
    %c0_19 = arith.constant 0 : index
    %c0_20 = arith.constant 0 : index
    %c0_21 = arith.constant 0 : index
    %c0_22 = arith.constant 0 : index
    %42 = vector.load %arg7[%c0_19, %c0_20, %c0_21, %c0_22] : memref<1x1x288x128xbf16, #tpu.memory_space<vmem>>, vector<1x1x144x128xbf16>
    %43 = vector.shape_cast %42 : vector<1x1x144x128xbf16> to vector<144x128xbf16>
    %44 = vector.shape_cast %41 : vector<144x128xbf16> to vector<1x1x144x128xbf16>
    tpu.vector_store %arg7[%c0_19, %c0_20, %c0_21, %c0_22], %44 {strides = array<i32>} : memref<1x1x288x128xbf16, #tpu.memory_space<vmem>>, vector<1x1x144x128xbf16>,
    %cst_23 = arith.constant 0.000000e+00 : f32
    %45 = vector.shape_cast %18 : vector<144x1xi1> to vector<144x1xi1>
    %46 = vector.broadcast %45 : vector<144x1xi1> to vector<144x128xi1>
    %47 = vector.broadcast %cst_23 : f32 to vector<144x128xf32>
    %48 = arith.select %46, %40, %47 : vector<144x128xi1>, vector<144x128xf32>
    %cst_24 = arith.constant dense<0.000000e+00> : vector<128xf32>
    %49 = vector.multi_reduction <add>, %48, %cst_24 [0] : vector<144x128xf32> to vector<128xf32>
    %50 = vector.shape_cast %49 : vector<128xf32> to vector<1x128xf32>
    %51 = arith.addf %22, %50 : vector<1x128xf32>
    %cst_25 = arith.constant 0.000000e+00 : f32
    %52 = vector.broadcast %cst_25 : f32 to vector<144x128xf32>
    %c0_26 = arith.constant 0 : index
    %c0_27 = arith.constant 0 : index
    %c0_28 = arith.constant 0 : index
    %c0_29 = arith.constant 0 : index
    %53 = vector.load %arg2[%c0_26, %c0_27, %c0_28, %c0_29] : memref<1x1x182x128xbf16, #tpu.memory_space<vmem>>, vector<1x1x144x128xbf16>
    %54 = vector.shape_cast %53 : vector<1x1x144x128xbf16> to vector<144x128xbf16>
    %c0_30 = arith.constant 0 : index
    %c0_31 = arith.constant 0 : index
    %c0_32 = arith.constant 0 : index
    %55 = vector.load %arg4[%c0_30, %c0_31, %c0_32] : memref<9x128x128xbf16, #tpu.memory_space<vmem>>, vector<1x128x128xbf16>
    %56 = vector.shape_cast %55 : vector<1x128x128xbf16> to vector<128x128xbf16>
    %cst_33 = arith.constant dense<0.000000e+00> : vector<144x128xf32>
    %57 = tpu.matmul %54, %56, %cst_33 {dimension_numbers = #tpu.dot_dimension_numbers<[1], [0], [0], [1], [0, 0, 1, 1], [], []>} : vector<144x128xbf16>, vector<128x128xbf16>, vector<144x128xf32> -> vector<144x128xf32>
    %58 = arith.addf %52, %57 : vector<144x128xf32>
    %c0_34 = arith.constant 0 : index
    %c0_35 = arith.constant 0 : index
    %c1 = arith.constant 1 : index
    %c0_36 = arith.constant 0 : index
    %59 = vector.load %arg2[%c0_34, %c0_35, %c1, %c0_36] : memref<1x1x182x128xbf16, #tpu.memory_space<vmem>>, vector<1x1x144x128xbf16>
    %60 = vector.shape_cast %59 : vector<1x1x144x128xbf16> to vector<144x128xbf16>
    %c1_37 = arith.constant 1 : index
    %c0_38 = arith.constant 0 : index
    %c0_39 = arith.constant 0 : index
    %61 = vector.load %arg4[%c1_37, %c0_38, %c0_39] : memref<9x128x128xbf16, #tpu.memory_space<vmem>>, vector<1x128x128xbf16>
    %62 = vector.shape_cast %61 : vector<1x128x128xbf16> to vector<128x128xbf16>
    %cst_40 = arith.constant dense<0.000000e+00> : vector<144x128xf32>
    %63 = tpu.matmul %60, %62, %cst_40 {dimension_numbers = #tpu.dot_dimension_numbers<[1], [0], [0], [1], [0, 0, 1, 1], [], []>} : vector<144x128xbf16>, vector<128x128xbf16>, vector<144x128xf32> -> vector<144x128xf32>
    %64 = arith.addf %58, %63 : vector<144x128xf32>
    %c0_41 = arith.constant 0 : index
    %c0_42 = arith.constant 0 : index
    %c2 = arith.constant 2 : index
    %c0_43 = arith.constant 0 : index
    %65 = vector.load %arg2[%c0_41, %c0_42, %c2, %c0_43] : memref<1x1x182x128xbf16, #tpu.memory_space<vmem>>, vector<1x1x144x128xbf16>
    %66 = vector.shape_cast %65 : vector<1x1x144x128xbf16> to vector<144x128xbf16>
    %c2_44 = arith.constant 2 : index
    %c0_45 = arith.constant 0 : index
    %c0_46 = arith.constant 0 : index
    %67 = vector.load %arg4[%c2_44, %c0_45, %c0_46] : memref<9x128x128xbf16, #tpu.memory_space<vmem>>, vector<1x128x128xbf16>
    %68 = vector.shape_cast %67 : vector<1x128x128xbf16> to vector<128x128xbf16>
    %cst_47 = arith.constant dense<0.000000e+00> : vector<144x128xf32>
    %69 = tpu.matmul %66, %68, %cst_47 {dimension_numbers = #tpu.dot_dimension_numbers<[1], [0], [0], [1], [0, 0, 1, 1], [], []>} : vector<144x128xbf16>, vector<128x128xbf16>, vector<144x128xf32> -> vector<144x128xf32>
    %70 = arith.addf %64, %69 : vector<144x128xf32>
    %c0_48 = arith.constant 0 : index
    %c0_49 = arith.constant 0 : index
    %c18 = arith.constant 18 : index
    %c0_50 = arith.constant 0 : index
    %71 = vector.load %arg2[%c0_48, %c0_49, %c18, %c0_50] : memref<1x1x182x128xbf16, #tpu.memory_space<vmem>>, vector<1x1x144x128xbf16>
    %72 = vector.shape_cast %71 : vector<1x1x144x128xbf16> to vector<144x128xbf16>
    %c3 = arith.constant 3 : index
    %c0_51 = arith.constant 0 : index
    %c0_52 = arith.constant 0 : index
    %73 = vector.load %arg4[%c3, %c0_51, %c0_52] : memref<9x128x128xbf16, #tpu.memory_space<vmem>>, vector<1x128x128xbf16>
    %74 = vector.shape_cast %73 : vector<1x128x128xbf16> to vector<128x128xbf16>
    %cst_53 = arith.constant dense<0.000000e+00> : vector<144x128xf32>
    %75 = tpu.matmul %72, %74, %cst_53 {dimension_numbers = #tpu.dot_dimension_numbers<[1], [0], [0], [1], [0, 0, 1, 1], [], []>} : vector<144x128xbf16>, vector<128x128xbf16>, vector<144x128xf32> -> vector<144x128xf32>
    %76 = arith.addf %70, %75 : vector<144x128xf32>
    %c0_54 = arith.constant 0 : index
    %c0_55 = arith.constant 0 : index
    %c19_56 = arith.constant 19 : index
    %c0_57 = arith.constant 0 : index
    %77 = vector.load %arg2[%c0_54, %c0_55, %c19_56, %c0_57] : memref<1x1x182x128xbf16, #tpu.memory_space<vmem>>, vector<1x1x144x128xbf16>
    %78 = vector.shape_cast %77 : vector<1x1x144x128xbf16> to vector<144x128xbf16>
    %c4 = arith.constant 4 : index
    %c0_58 = arith.constant 0 : index
    %c0_59 = arith.constant 0 : index
    %79 = vector.load %arg4[%c4, %c0_58, %c0_59] : memref<9x128x128xbf16, #tpu.memory_space<vmem>>, vector<1x128x128xbf16>
    %80 = vector.shape_cast %79 : vector<1x128x128xbf16> to vector<128x128xbf16>
    %cst_60 = arith.constant dense<0.000000e+00> : vector<144x128xf32>
    %81 = tpu.matmul %78, %80, %cst_60 {dimension_numbers = #tpu.dot_dimension_numbers<[1], [0], [0], [1], [0, 0, 1, 1], [], []>} : vector<144x128xbf16>, vector<128x128xbf16>, vector<144x128xf32> -> vector<144x128xf32>
    %82 = arith.addf %76, %81 : vector<144x128xf32>
    %c0_61 = arith.constant 0 : index
    %c0_62 = arith.constant 0 : index
    %c20 = arith.constant 20 : index
    %c0_63 = arith.constant 0 : index
    %83 = vector.load %arg2[%c0_61, %c0_62, %c20, %c0_63] : memref<1x1x182x128xbf16, #tpu.memory_space<vmem>>, vector<1x1x144x128xbf16>
    %84 = vector.shape_cast %83 : vector<1x1x144x128xbf16> to vector<144x128xbf16>
    %c5 = arith.constant 5 : index
    %c0_64 = arith.constant 0 : index
    %c0_65 = arith.constant 0 : index
    %85 = vector.load %arg4[%c5, %c0_64, %c0_65] : memref<9x128x128xbf16, #tpu.memory_space<vmem>>, vector<1x128x128xbf16>
    %86 = vector.shape_cast %85 : vector<1x128x128xbf16> to vector<128x128xbf16>
    %cst_66 = arith.constant dense<0.000000e+00> : vector<144x128xf32>
    %87 = tpu.matmul %84, %86, %cst_66 {dimension_numbers = #tpu.dot_dimension_numbers<[1], [0], [0], [1], [0, 0, 1, 1], [], []>} : vector<144x128xbf16>, vector<128x128xbf16>, vector<144x128xf32> -> vector<144x128xf32>
    %88 = arith.addf %82, %87 : vector<144x128xf32>
    %c0_67 = arith.constant 0 : index
    %c0_68 = arith.constant 0 : index
    %c36 = arith.constant 36 : index
    %c0_69 = arith.constant 0 : index
    %89 = vector.load %arg2[%c0_67, %c0_68, %c36, %c0_69] : memref<1x1x182x128xbf16, #tpu.memory_space<vmem>>, vector<1x1x144x128xbf16>
    %90 = vector.shape_cast %89 : vector<1x1x144x128xbf16> to vector<144x128xbf16>
    %c6 = arith.constant 6 : index
    %c0_70 = arith.constant 0 : index
    %c0_71 = arith.constant 0 : index
    %91 = vector.load %arg4[%c6, %c0_70, %c0_71] : memref<9x128x128xbf16, #tpu.memory_space<vmem>>, vector<1x128x128xbf16>
    %92 = vector.shape_cast %91 : vector<1x128x128xbf16> to vector<128x128xbf16>
    %cst_72 = arith.constant dense<0.000000e+00> : vector<144x128xf32>
    %93 = tpu.matmul %90, %92, %cst_72 {dimension_numbers = #tpu.dot_dimension_numbers<[1], [0], [0], [1], [0, 0, 1, 1], [], []>} : vector<144x128xbf16>, vector<128x128xbf16>, vector<144x128xf32> -> vector<144x128xf32>
    %94 = arith.addf %88, %93 : vector<144x128xf32>
    %c0_73 = arith.constant 0 : index
    %c0_74 = arith.constant 0 : index
    %c37 = arith.constant 37 : index
    %c0_75 = arith.constant 0 : index
    %95 = vector.load %arg2[%c0_73, %c0_74, %c37, %c0_75] : memref<1x1x182x128xbf16, #tpu.memory_space<vmem>>, vector<1x1x144x128xbf16>
    %96 = vector.shape_cast %95 : vector<1x1x144x128xbf16> to vector<144x128xbf16>
    %c7 = arith.constant 7 : index
    %c0_76 = arith.constant 0 : index
    %c0_77 = arith.constant 0 : index
    %97 = vector.load %arg4[%c7, %c0_76, %c0_77] : memref<9x128x128xbf16, #tpu.memory_space<vmem>>, vector<1x128x128xbf16>
    %98 = vector.shape_cast %97 : vector<1x128x128xbf16> to vector<128x128xbf16>
    %cst_78 = arith.constant dense<0.000000e+00> : vector<144x128xf32>
    %99 = tpu.matmul %96, %98, %cst_78 {dimension_numbers = #tpu.dot_dimension_numbers<[1], [0], [0], [1], [0, 0, 1, 1], [], []>} : vector<144x128xbf16>, vector<128x128xbf16>, vector<144x128xf32> -> vector<144x128xf32>
    %100 = arith.addf %94, %99 : vector<144x128xf32>
    %c0_79 = arith.constant 0 : index
    %c0_80 = arith.constant 0 : index
    %c38 = arith.constant 38 : index
    %c0_81 = arith.constant 0 : index
    %101 = vector.load %arg2[%c0_79, %c0_80, %c38, %c0_81] : memref<1x1x182x128xbf16, #tpu.memory_space<vmem>>, vector<1x1x144x128xbf16>
    %102 = vector.shape_cast %101 : vector<1x1x144x128xbf16> to vector<144x128xbf16>
    %c8 = arith.constant 8 : index
    %c0_82 = arith.constant 0 : index
    %c0_83 = arith.constant 0 : index
    %103 = vector.load %arg4[%c8, %c0_82, %c0_83] : memref<9x128x128xbf16, #tpu.memory_space<vmem>>, vector<1x128x128xbf16>
    %104 = vector.shape_cast %103 : vector<1x128x128xbf16> to vector<128x128xbf16>
    %cst_84 = arith.constant dense<0.000000e+00> : vector<144x128xf32>
    %105 = tpu.matmul %102, %104, %cst_84 {dimension_numbers = #tpu.dot_dimension_numbers<[1], [0], [0], [1], [0, 0, 1, 1], [], []>} : vector<144x128xbf16>, vector<128x128xbf16>, vector<144x128xf32> -> vector<144x128xf32>
    %106 = arith.addf %100, %105 : vector<144x128xf32>
    %c1_85 = arith.constant 1 : index
    %c0_86 = arith.constant 0 : index
    %c0_87 = arith.constant 0 : index
    %107 = vector.load %arg5[%c1_85, %c0_86, %c0_87] : memref<2x1x128xf32, #tpu.memory_space<vmem>>, vector<1x1x128xf32>
    %108 = vector.shape_cast %107 : vector<1x1x128xf32> to vector<1x128xf32>
    %109 = vector.broadcast %108 : vector<1x128xf32> to vector<144x128xf32>
    %110 = arith.mulf %106, %109 : vector<144x128xf32>
    %c1_88 = arith.constant 1 : index
    %c0_89 = arith.constant 0 : index
    %c0_90 = arith.constant 0 : index
    %111 = vector.load %arg6[%c1_88, %c0_89, %c0_90] : memref<2x1x128xf32, #tpu.memory_space<vmem>>, vector<1x1x128xf32>
    %112 = vector.shape_cast %111 : vector<1x1x128xf32> to vector<1x128xf32>
    %113 = vector.broadcast %112 : vector<1x128xf32> to vector<144x128xf32>
    %114 = arith.addf %110, %113 : vector<144x128xf32>
    %cst_91 = arith.constant 2.000000e-01 : f32
    %115 = vector.broadcast %cst_91 : f32 to vector<144x128xf32>
    %116 = arith.mulf %115, %114 : vector<144x128xf32>
    %117 = arith.maximumf %114, %116 : vector<144x128xf32>
    %118 = arith.truncf %117 : vector<144x128xf32> to vector<144x128xbf16>
    %c0_92 = arith.constant 0 : index
    %c0_93 = arith.constant 0 : index
    %c144 = arith.constant 144 : index
    %c0_94 = arith.constant 0 : index
    %119 = vector.load %arg7[%c0_92, %c0_93, %c144, %c0_94] : memref<1x1x288x128xbf16, #tpu.memory_space<vmem>>, vector<1x1x144x128xbf16>
    %120 = vector.shape_cast %119 : vector<1x1x144x128xbf16> to vector<144x128xbf16>
    %121 = vector.shape_cast %118 : vector<144x128xbf16> to vector<1x1x144x128xbf16>
    tpu.vector_store %arg7[%c0_92, %c0_93, %c144, %c0_94], %121 {strides = array<i32>} : memref<1x1x288x128xbf16, #tpu.memory_space<vmem>>, vector<1x1x144x128xbf16>,
    %cst_95 = arith.constant 0.000000e+00 : f32
    %122 = vector.shape_cast %18 : vector<144x1xi1> to vector<144x1xi1>
    %123 = vector.broadcast %122 : vector<144x1xi1> to vector<144x128xi1>
    %124 = vector.broadcast %cst_95 : f32 to vector<144x128xf32>
    %125 = arith.select %123, %117, %124 : vector<144x128xi1>, vector<144x128xf32>
    %cst_96 = arith.constant dense<0.000000e+00> : vector<128xf32>
    %126 = vector.multi_reduction <add>, %125, %cst_96 [0] : vector<144x128xf32> to vector<128xf32>
    %127 = vector.shape_cast %126 : vector<128xf32> to vector<1x128xf32>
    %128 = arith.addf %51, %127 : vector<1x128xf32>
    %c0_97 = arith.constant 0 : index
    %c0_98 = arith.constant 0 : index
    %c0_99 = arith.constant 0 : index
    %129 = vector.load %arg8[%c0_97, %c0_98, %c0_99] : memref<1x1x128xf32, #tpu.memory_space<vmem>>, vector<1x1x128xf32>
    %130 = vector.shape_cast %129 : vector<1x1x128xf32> to vector<1x128xf32>
    %131 = arith.addf %130, %128 : vector<1x128xf32>
    %c0_100 = arith.constant 0 : index
    %c0_101 = arith.constant 0 : index
    %c0_102 = arith.constant 0 : index
    %132 = vector.load %arg8[%c0_100, %c0_101, %c0_102] : memref<1x1x128xf32, #tpu.memory_space<vmem>>, vector<1x1x128xf32>
    %133 = vector.shape_cast %132 : vector<1x1x128xf32> to vector<1x128xf32>
    %134 = vector.shape_cast %131 : vector<1x128xf32> to vector<1x1x128xf32>
    tpu.vector_store %arg8[%c0_100, %c0_101, %c0_102], %134 {strides = array<i32>} : memref<1x1x128xf32, #tpu.memory_space<vmem>>, vector<1x1x128xf32>,
    return
  }
  func.func @transform_0(%arg0: i32, %arg1: i32) -> (i32, i32, i32, i32) {
    %c0_i32 = arith.constant 0 : i32
    %c0_i32_0 = arith.constant 0 : i32
    %c0_i32_1 = arith.constant 0 : i32
    return %arg0, %arg1, %c0_i32, %c0_i32_0 : i32, i32, i32, i32
  }
  func.func @transform_1(%arg0: i32, %arg1: i32) -> (i32, i32, i32) {
    %c0_i32 = arith.constant 0 : i32
    %c0_i32_0 = arith.constant 0 : i32
    %c0_i32_1 = arith.constant 0 : i32
    %c0_i32_2 = arith.constant 0 : i32
    return %c0_i32, %c0_i32_0, %c0_i32_1 : i32, i32, i32
  }
  func.func @transform_2(%arg0: i32, %arg1: i32) -> (i32, i32, i32) {
    %c0_i32 = arith.constant 0 : i32
    %c0_i32_0 = arith.constant 0 : i32
    %c0_i32_1 = arith.constant 0 : i32
    %c0_i32_2 = arith.constant 0 : i32
    return %c0_i32, %c0_i32_0, %c0_i32_1 : i32, i32, i32
  }
  func.func @transform_3(%arg0: i32, %arg1: i32) -> (i32, i32, i32) {
    %c0_i32 = arith.constant 0 : i32
    %c0_i32_0 = arith.constant 0 : i32
    %c0_i32_1 = arith.constant 0 : i32
    %c0_i32_2 = arith.constant 0 : i32
    return %c0_i32, %c0_i32_0, %c0_i32_1 : i32, i32, i32
  }
  func.func @transform_4(%arg0: i32, %arg1: i32) -> (i32, i32, i32) {
    %c0_i32 = arith.constant 0 : i32
    %c0_i32_0 = arith.constant 0 : i32
    %c0_i32_1 = arith.constant 0 : i32
    %c0_i32_2 = arith.constant 0 : i32
    return %c0_i32, %c0_i32_0, %c0_i32_1 : i32, i32, i32
  }
  func.func @transform_5(%arg0: i32, %arg1: i32) -> (i32, i32, i32, i32) {
    %c0_i32 = arith.constant 0 : i32
    %c0_i32_0 = arith.constant 0 : i32
    %c0_i32_1 = arith.constant 0 : i32
    return %arg0, %arg1, %c0_i32, %c0_i32_0 : i32, i32, i32, i32
  }
  func.func @transform_6(%arg0: i32, %arg1: i32) -> (i32, i32, i32) {
    %c0_i32 = arith.constant 0 : i32
    %c0_i32_0 = arith.constant 0 : i32
    %c0_i32_1 = arith.constant 0 : i32
    return %arg0, %c0_i32, %c0_i32_0 : i32, i32, i32
  }
}

</mosaic_0001>

<bundles_post_ra>
// kernel: tpu_custom_call.1
= control target key start
LH: loop header
LB: loop body
LE: loop exit
PB: predicated region body
PF: predicated region fallthrough
CT: control target
= control target key end

     0   :  { %s7500_s0 = inlined_call_operand.vmem [shape: bf16[2,2,182,128], index: 0, kind: input, shape index: {}]   ;;  %s7501_s1 = inlined_call_operand.vmem [shape: bf16[1,128,128], index: 1, kind: input, shape index: {}]   ;;  %s7502_s2 = inlined_call_operand.vmem [shape: bf16[9,128,128], index: 2, kind: input, shape index: {}]   ;;  %s7503_s3 = inlined_call_operand.vmem [shape: f32[2,1,128], index: 3, kind: input, shape index: {}]   ;;  %s7504_s4 = inlined_call_operand.vmem [shape: f32[2,1,128], index: 4, kind: input, shape index: {}]   ;;  %s7505_s5 = inlined_call_operand.hbm [shape: bf16[2,2,288,128], index: 5, kind: output, shape index: {0}]   ;;  %s7506_s6 = inlined_call_operand.hbm [shape: f32[2,1,128], index: 6, kind: output, shape index: {1}]  }
   0x1   :  { %7524 = sst [smem:[#allocation13_spill]] %s7500_s0 }
   0x2   :  { %7525 = sst [smem:[#allocation14_spill]] %s7501_s1 }
   0x3   :  { %12 = vsyncpa [#allocation3], 0 }
   0x4   :  { %14 = vsyncpa [#allocation3 + $0x1], 0 }
   0x5   :  { %15 = vsyncpa [#allocation5], 0 }
   0x6   :  { %17 = vsyncpa [#allocation5 + $0x1], 0  ;;  %s5770_s21 = smov 0   ;;  %s5772_s22 = smov 0  }
   0x7   :  { %s5774_s23 = smov 0   ;;  %s5776_s24 = smov 0  }
   0x8   :  { %s5778_s25 = smov 0   ;;  %s5780_s26 = smov 0  }
   0x9   :  { %s5782_s27 = smov 0   ;;  %s5784_s28 = smov 0  }
   0xa   :  { %s5786_s29 = smov 0   ;;  %s5788_s30 = smov 0  }
   0xb   :  { %s5790_s7 = smov 0  }
   0xc LB: > { %7526 = sst [smem:[#allocation8_spill]] %s5718_s29  ;;  %s3888_s8 = sadd.s32 4294967295, %s5726_s7   ;;  %s5726_s7 = sphi %s5790_s7, %s23_s7   ;;  %s5722_s30 = sphi %s5788_s30, %s7657_s30   ;;  %s5718_s29 = sphi %s5786_s29, %s7656_s29   ;;  %s5714_s28 = sphi %s5784_s28, %s7655_s28   ;;  %s5710_s27 = sphi %s5782_s27, %s7654_s27   ;;  %s5706_s26 = sphi %s5780_s26, %s7663_s26   ;;  %s5702_s25 = sphi %s5778_s25, %s7662_s25   ;;  %s5698_s24 = sphi %s5776_s24, %s7661_s24   ;;  %s5694_s23 = sphi %s5774_s23, %s7660_s23   ;;  %s5690_s22 = sphi %s5772_s22, %s7659_s22   ;;  %s5686_s21 = sphi %s5770_s21, %s7658_s21  }
   0xd   : > { %7527 = sst [smem:[#allocation9_spill]] %s5722_s30  ;;  %s3889_s9 = sadd.s32 4294967294, %s5726_s7  }
   0xe   : > { %s32_s10 = sadd.s32 1, %s5718_s29  ;;  %s35_s11 = sadd.s32 1, %s5722_s30 }
   0xf   : > { %p33_p0 = scmp.ge.s32.totalorder %s32_s10, 2  ;;  %s156_s12 = sadd.s32 1, %s5706_s26 }
  0x10   : > { %p166_p1 = scmp.ne.s32.totalorder %s5706_s26, %s5702_s25  ;;  %p5832_p2 = scmp.eq.s32.totalorder %s3888_s8, 3 }
  0x11   : > { %s7665_s10 = smov (%p33_p0, %s32_s10), 0  ;;  %s7667_s11 = smov (!%p33_p0, %s35_s11), %s5722_s30 }
  0x12   : > { %7529 = sst [smem:[#allocation10_spill]] %s7665_s10  ;;  %s152_s14 = ssub.s32 %s5718_s29, %s7665_s10 }
  0x13   : > { %p5843_p3 = por %p5832_p2, %p166_p1  ;;  %p37_p4 = scmp.ge.s32.totalorder %s7667_s11, 2 }
  0x14   : > { %p172_p5 = scmp.ne.s32.totalorder %s5702_s25, %s5698_s24  ;;  %p5849_p6 = scmp.eq.s32.totalorder %s3889_s9, 3 }
  0x15   : > { %s182_s17 = sadd.s32 1, %s5694_s23  ;;  %s7669_s11 = smov (%p37_p4, %s7667_s11), 0 }
  0x16   : > { %7532 = sst [smem:[#allocation11_spill]] %s7669_s11  ;;  %p5858_p7 = por %p5849_p6, %p172_p5 }
  0x17   : > { %p192_p8 = scmp.ne.s32.totalorder %s5694_s23, %s5690_s22  ;;  %s151_s19 = ssub.s32 %s5722_s30, %s7669_s11 }
  0x18   : > { %p198_p9 = scmp.ne.s32.totalorder %s5690_s22, %s5686_s21  ;;  %s153_s20 = sor.u32 %s152_s14, %s151_s19 }
  0x19   : > { %p180_p10 = scmp.eq.s32.totalorder %s151_s19, 0  ;;  %p154_p11 = scmp.eq.s32.totalorder %s153_s20, 0 }
  0x1a   : > { %p5870_p12 = por %p192_p8, %p5832_p2  ;;  %p5882_p13 = por %p198_p9, %p5849_p6 }
  0x1b   : > { %s5875_s9 = scalar_select %p180_p10, %s5694_s23, %s182_s17  }
  0x1c   : > { %s5878_s10 = scalar_select %p154_p11, %s5706_s26, %s156_s12  }
  0x1d   : > { %p3892_p0 = scmp.ge.s32.totalorder %s5726_s7, 1  ;;  %p241_p1 = scmp.lt.s32.totalorder %s5726_s7, 5 }
  0x1e   : > { %7535 = sst [smem:[#allocation12_spill]] %s5878_s10 }
  0x1f   : > { %p242_p4 = pnand %p3892_p0, %p241_p1 }
  0x20   : > { %s7509_s13 = sand.u32 (!%p242_p4), 1, %s5702_s25   ;;  %v289_v0 = vlaneseq (!%p242_p4)  ;;  %p279_p2 = scmp.lt.s32.totalorder (!%p242_p4), %s5714_s28, 1 }
  0x21   : > { %245 = sbr.rel (%p242_p4) target bundleno = 749 (0x2ed), region = 40  ;;  %p281_p5 = scmp.lt.s32.totalorder (!%p242_p4), %s5710_s27, 1 }
  0x22   : > { %s5892_s12 = smul.u32 (!%p242_p4), 144, %s7509_s13  ;;  %v290_v1 = vshrl.u32 (!%p242_p4), %v289_v0, 7  ;;  %s7537_s0 = sld [smem:[#allocation13_spill]] (!%p242_p4) }
  0x23   : > { %s7629_s14 = sand.u32 (!%p242_p4), 1, %s5690_s22   ;;  %p3894_p6 = scmp.ne.s32.totalorder (!%p242_p4), %s5710_s27, 0 }
  0x24   : > { %v291_v2 = vadd.s32 (!%p242_p4), 8, %v290_v1  ;;  %v292_v3 = vadd.s32 (!%p242_p4), 16, %v290_v1  ;;  %v293_v4 = vadd.s32 (!%p242_p4), 24, %v290_v1  ;;  %v294_v5 = vadd.s32 (!%p242_p4), 32, %v290_v1 }
  0x25   : > { %v5898_v6 = vadd.s32 (!%p242_p4), 40, %v290_v1  ;;  %v5900_v7 = vadd.s32 (!%p242_p4), 48, %v290_v1  ;;  %v5902_v8 = vadd.s32 (!%p242_p4), 56, %v290_v1  ;;  %v5904_v9 = vadd.s32 (!%p242_p4), 64, %v290_v1 }
  0x26   : > { %v5906_v10 = vadd.s32 (!%p242_p4), 72, %v290_v1  ;;  %v5908_v11 = vmul.u32.u64.low (!%p242_p4), 3817748708, %v290_v1  ;;  %v5909_v12 = vmul.u32.u64.high 3817748708, %v290_v1, %v5908_v11  ;;  %v5936_v25 = vadd.s32 (!%p242_p4), 80, %v290_v1 }
  0x27   : > { %v5911_v13 = vmul.u32.u64.low (!%p242_p4), 3817748708, %v291_v2  ;;  %v5912_v14 = vmul.u32.u64.high 3817748708, %v291_v2, %v5911_v13  ;;  %v5914_v15 = vmul.u32.u64.low (!%p242_p4), 3817748708, %v292_v3  ;;  %v5915_v16 = vmul.u32.u64.high 3817748708, %v292_v3, %v5914_v15 }
  0x28   : > { %s280_s16 = scalar_select %p279_p2, %s5714_s28, 1  ;;  %v5917_v17 = vmul.u32.u64.low 3817748708, %v293_v4  ;;  %v5918_v18 = vmul.u32.u64.high 3817748708, %v293_v4, %v5917_v17  ;;  %v5920_v19 = vmul.u32.u64.low 3817748708, %v294_v5  ;;  %v5921_v20 = vmul.u32.u64.high 3817748708, %v294_v5, %v5920_v19 }
  0x29   : > { %s282_s17 = scalar_select %p281_p5, %s5710_s27, 1  ;;  %v5929_v21 = vmul.u32.u64.low 3817748708, %v5898_v6  ;;  %v5930_v22 = vmul.u32.u64.high 3817748708, %v5898_v6, %v5929_v21  ;;  %v5933_v23 = vmul.u32.u64.low 3817748708, %v5900_v7  ;;  %v5934_v24 = vmul.u32.u64.high 3817748708, %v5900_v7, %v5933_v23 }
  0x2a   : > { %s5299_s19 = smul.u32 46, %s280_s16  ;;  %v314_v26 = vshrl.u32 %v5909_v12, 4  ;;  %v5940_v27 = vmul.u32.u64.low 3817748708, %v5902_v8  ;;  %v5941_v28 = vmul.u32.u64.high 3817748708, %v5902_v8, %v5940_v27  ;;  %v325_v29 = vshrl.u32 %v5912_v14, 4 }
  0x2b   : > { %s5298_s20 = smul.u32 23, %s282_s17  ;;  %v336_v30 = vshrl.u32 %v5915_v16, 4  ;;  %v5946_v31 = vmul.u32.u64.low 3817748708, %v5904_v9  ;;  %v5947_v32 = vmul.u32.u64.high 3817748708, %v5904_v9, %v5946_v31  ;;  %v5949_v33 = vadd.s32 88, %v290_v1 }
  0x2c   : > { %v315_v34 = vmul.u32 18, %v314_v26  ;;  %v347_v35 = vshrl.u32 %v5918_v18, 4  ;;  %v358_v36 = vshrl.u32 %v5921_v20, 4  ;;  %v5953_v37 = vadd.s32 96, %v290_v1 }
  0x2d   : > { %s285_s13 = sadd.s32 %s5299_s19, %s5298_s20  ;;  %v326_v38 = vmul.u32 18, %v325_v29  ;;  %v337_v39 = vmul.u32 18, %v336_v30  ;;  %v369_v40 = vshrl.u32 %v5930_v22, 4  ;;  %v5956_v41 = vadd.s32 104, %v290_v1  ;;  %s6374_s19 = scalar_lea.vmem [#allocation4], %s7629_s14 }
  0x2e   : > { %s3893_s16 = sshll.u32 %s285_s13, 2  ;;  %v5958_v42 = vadd.s32 112, %v290_v1  ;;  %v348_v43 = vmul.u32 18, %v347_v35  ;;  %v380_v44 = vshrl.u32 %v5934_v24, 4  ;;  %v5961_v45 = vadd.s32 120, %v290_v1  ;;  %s6370_s13 = scalar_lea.vmem [#allocation2], %s5892_s12 }
  0x2f   : > { %s5926_s11 = scalar_lea.vmem %s7537_s0, %s3893_s16  ;;  %v5963_v46 = vadd.s32 128, %v290_v1  ;;  %v5965_v47 = vadd.s32 136, %v290_v1  ;;  %v5967_v48 = vsub.s32 %v290_v1, %v315_v34  ;;  %v5969_v49 = vsub.s32 %v291_v2, %v326_v38 }
  0x30   : > { %v5971_v50 = vsub.s32 %v292_v3, %v337_v39  ;;  %v359_v51 = vmul.u32 18, %v358_v36  ;;  %v391_v52 = vshrl.u32 %v5941_v28, 4  ;;  %v370_v53 = vmul.u32 18, %v369_v40 }
  0x31   : > { %v402_v54 = vshrl.u32 %v5947_v32, 4  ;;  %v5976_v55 = vmul.u32.u64.low 3817748708, %v5906_v10  ;;  %v5977_v56 = vmul.u32.u64.high 3817748708, %v5906_v10, %v5976_v55  ;;  %v5979_v57 = vsub.s32 %v293_v4, %v348_v43 }
  0x32   : > { %v381_v58 = vmul.u32 18, %v380_v44  ;;  %v5982_v59 = vmul.u32.u64.low 3817748708, %v5936_v25  ;;  %v5983_v60 = vmul.u32.u64.high 3817748708, %v5936_v25, %v5982_v59  ;;  %v5993_v1 = vsub.s32 %v294_v5, %v359_v51 }
  0x33   : > { %v5986_v61 = vmul.u32.u64.low 3817748708, %v5949_v33  ;;  %v5987_v62 = vmul.u32.u64.high 3817748708, %v5949_v33, %v5986_v61  ;;  %v5990_v63 = vmul.u32.u64.low 3817748708, %v5953_v37  ;;  %v5991_v0 = vmul.u32.u64.high 3817748708, %v5953_v37, %v5990_v63 }
  0x34   : > { %v392_v2 = vmul.u32 18, %v391_v52  ;;  %v5996_v3 = vmul.u32.u64.low 3817748708, %v5956_v41  ;;  %v5997_v4 = vmul.u32.u64.high 3817748708, %v5956_v41, %v5996_v3  ;;  %v413_v12 = vshrl.u32 %v5977_v56, 4 }
  0x35   : > { %v403_v11 = vmul.u32 18, %v402_v54  ;;  %v6001_v13 = vmul.u32.u64.low 3817748708, %v5958_v42  ;;  %v6002_v14 = vmul.u32.u64.high 3817748708, %v5958_v42, %v6001_v13  ;;  %v6005_v15 = vsub.s32 %v5898_v6, %v370_v53 }
  0x36   : > { %v424_v16 = vshrl.u32 %v5983_v60, 4  ;;  %v6009_v5 = vmul.u32.u64.low 3817748708, %v5961_v45  ;;  %v6010_v17 = vmul.u32.u64.high 3817748708, %v5961_v45, %v6009_v5  ;;  %v6013_v18 = vsub.s32 %v5900_v7, %v381_v58 }
  0x37   : > { %v414_v19 = vmul.u32 18, %v413_v12  ;;  %v435_v20 = vshrl.u32 %v5987_v62, 4  ;;  %v446_v21 = vshrl.u32 %v5991_v0, 4  ;;  %v457_v23 = vshrl.u32 %v5997_v4, 4 }
  0x38   : > { %v425_v22 = vmul.u32 18, %v424_v16  ;;  %v6019_v6 = vmul.u32.u64.low 3817748708, %v5963_v46  ;;  %v6020_v24 = vmul.u32.u64.high 3817748708, %v5963_v46, %v6019_v6  ;;  %v6023_v26 = vsub.s32 %v5902_v8, %v392_v2 }
  0x39   : > { %v6026_v27 = vsub.s32 %v5904_v9, %v403_v11  ;;  %v436_v7 = vmul.u32 18, %v435_v20  ;;  %v468_v28 = vshrl.u32 %v6002_v14, 4  ;;  %v447_v29 = vmul.u32 18, %v446_v21 }
  0x3a   : > { %v458_v30 = vmul.u32 18, %v457_v23  ;;  %v479_v31 = vshrl.u32 %v6010_v17, 4  ;;  %vm506_vm0 = vcmp.ne.s32.totalorder %v5967_v48, 0  ;;  %vm507_vm1 = vcmp.ne.s32.totalorder %v5969_v49, 0 }
  0x3b   : > { %v469_v32 = vmul.u32 18, %v468_v28  ;;  %vm508_vm2 = vcmp.ne.s32.totalorder %v5971_v50, 0  ;;  %vm509_vm3 = vcmp.ne.s32.totalorder %v5979_v57, 0  ;;  %v6035_v8 = vsub.s32 %v5906_v10, %v414_v19 }
  0x3c   : > { %v6038_v9 = vsub.s32 %v5936_v25, %v425_v22  ;;  %v480_v34 = vmul.u32 18, %v479_v31  ;;  %v490_v35 = vshrl.u32 %v6020_v24, 4  ;;  %v6042_v36 = vsub.s32 %v5949_v33, %v436_v7 }
  0x3d   : > { %v6045_v38 = vmul.u32.u64.low 3817748708, %v5965_v47  ;;  %v6046_v39 = vmul.u32.u64.high 3817748708, %v5965_v47, %v6045_v38  ;;  %vm510_vm4 = vcmp.ne.s32.totalorder %v5993_v1, 0  ;;  %v6050_v40 = vsub.s32 %v5953_v37, %v447_v29 }
  0x3e   : > { %v6053_v10 = vsub.s32 %v5956_v41, %v458_v30  ;;  %v491_v25 = vmul.u32 18, %v490_v35  ;;  %v6057_v43 = vsub.s32 %v5958_v42, %v469_v32  ;;  %v6060_v33 = vsub.s32 %v5961_v45, %v480_v34 }
  0x3f   : > { %vm524_vm11 = vcmp.lt.s32.totalorder %v5967_v48, 0  ;;  %v501_v37 = vshrl.u32 %v6046_v39, 4  ;;  %vm525_vm13 = vcmp.lt.s32.totalorder %v5969_v49, 0  ;;  %vm526_vm14 = vcmp.lt.s32.totalorder %v5971_v50, 0 }
  0x40   : > { %vm527_vm15 = vcmp.lt.s32.totalorder %v5979_v57, 0  ;;  %vm6075_vm7 = vmand %vm524_vm11, %vm506_vm0  ;;  %v6080_v42 = vsub.s32 %v5963_v46, %v491_v25  ;;  %vm528_vm9 = vcmp.lt.s32.totalorder %v5993_v1, 0  ;;  %vm531_vm6 = vcmp.lt.s32.totalorder %v6023_v26, 0 }
  0x41   : > { %vm6087_vm8 = vmand %vm525_vm13, %vm507_vm1  ;;  %v502_v45 = vmul.u32 18, %v501_v37  ;;  %vm533_vm13 = vcmp.lt.s32.totalorder %v6035_v8, 0  ;;  %vm538_vm1 = vcmp.lt.s32.totalorder %v6057_v43, 0  ;;  %v560_v54 = vadd.s32 18, %v5967_v48 }
  0x42   : > { %vm6097_vm10 = vmand %vm526_vm14, %vm508_vm2  ;;  %vm7548_vm2 = vcmp.ne.s32.totalorder %v6005_v15, 0  ;;  %vm7549_vm14 = vcmp.lt.s32.totalorder %v6005_v15, 0  ;;  %v561_v55 = vadd.s32 18, %v5969_v49  ;;  %v562_v56 = vadd.s32 18, %v5971_v50 }
  0x43   : > { %vm6110_vm5 = vmand %vm527_vm15, %vm509_vm3  ;;  %v6115_v52 = vsub.s32 %v5965_v47, %v502_v45  ;;  %v563_v58 = vadd.s32 18, %v5979_v57  ;;  %vm7552_vm15 = vcmp.ne.s32.totalorder %v6013_v18, 0  ;;  %vm7553_vm3 = vcmp.lt.s32.totalorder %v6013_v18, 0 }
  0x44   : > { %vm6125_vm11 = vmand %vm528_vm9, %vm510_vm4  ;;  %v564_v60 = vadd.s32 18, %v5993_v1  ;;  %v565_v61 = vadd.s32 18, %v6005_v15  ;;  %v566_v63 = vadd.s32 18, %v6013_v18  ;;  %v567_v0 = vadd.s32 18, %v6023_v26 }
  0x45   : > { %vm6135_vm12 = vmand %vm7549_vm14, %vm7548_vm2  ;;  %vm7556_vm14 = vcmp.ne.s32.totalorder %v6023_v26, 0  ;;  %v568_v2 = vadd.s32 18, %v6026_v27  ;;  %v569_v3 = vadd.s32 18, %v6035_v8  ;;  %v570_v11 = vadd.s32 18, %v6038_v9 }
  0x46   : > { %vm6149_vm2 = vmand %vm7553_vm3, %vm7552_vm15  ;;  %vm7559_vm3 = vcmp.ne.s32.totalorder %v6026_v27, 0  ;;  %vm7560_vm15 = vcmp.lt.s32.totalorder %v6026_v27, 0  ;;  %v571_v12 = vadd.s32 18, %v6042_v36  ;;  %v572_v13 = vadd.s32 18, %v6050_v40 }
  0x47   : > { %vm6159_vm0 = vmand %vm531_vm6, %vm7556_vm14  ;;  %v573_v14 = vadd.s32 18, %v6053_v10  ;;  %vm7563_vm6 = vcmp.ne.s32.totalorder %v6035_v8, 0  ;;  %v574_v5 = vadd.s32 18, %v6057_v43  ;;  %v575_v17 = vadd.s32 18, %v6060_v33 }
  0x48   : > { %vm6171_vm9 = vmand %vm7560_vm15, %vm7559_vm3  ;;  %v576_v19 = vadd.s32 18, %v6080_v42  ;;  %v577_v20 = vadd.s32 18, %v6115_v52  ;;  %vm7566_vm3 = vcmp.ne.s32.totalorder %v6038_v9, 0  ;;  %vm7567_vm15 = vcmp.lt.s32.totalorder %v6038_v9, 0 }
  0x49   : > { %vm6183_vm14 = vmand %vm533_vm13, %vm7563_vm6  ;;  %v578_v22 = vsel %vm6075_vm7, %v560_v54, %v5967_v48  ;;  %v579_v23 = vsel %vm6087_vm8, %v561_v55, %v5969_v49  ;;  %v580_v6 = vsel %vm6097_vm10, %v562_v56, %v5971_v50  ;;  %v581_v24 = vsel %vm6110_vm5, %v563_v58, %v5979_v57 }
  0x4a   : > { %vm6195_vm4 = vmand %vm7567_vm15, %vm7566_vm3  ;;  %vm7570_vm13 = vcmp.ne.s32.totalorder %v6042_v36, 0  ;;  %vm7571_vm6 = vcmp.lt.s32.totalorder %v6042_v36, 0  ;;  %v582_v48 = vsel %vm6125_vm11, %v564_v60, %v5993_v1  ;;  %v583_v49 = vsel %vm6135_vm12, %v565_v61, %v6005_v15 }
  0x4b   : > { %vm6215_vm3 = vmand %vm7571_vm6, %vm7570_vm13  ;;  %v584_v50 = vsel %vm6149_vm2, %v566_v63, %v6013_v18  ;;  %v585_v57 = vsel %vm6159_vm0, %v567_v0, %v6023_v26  ;;  %vm7574_vm5 = vcmp.ne.s32.totalorder %v6050_v40, 0  ;;  %vm7575_vm7 = vcmp.lt.s32.totalorder %v6050_v40, 0 }
  0x4c   : > { %vm6235_vm8 = vmand %vm7575_vm7, %vm7574_vm5  ;;  %v586_v1 = vsel %vm6171_vm9, %v568_v2, %v6026_v27  ;;  %v587_v15 = vsel %vm6183_vm14, %v569_v3, %v6035_v8  ;;  %v588_v18 = vsel %vm6195_vm4, %v570_v11, %v6038_v9  ;;  %v589_v26 = vsel %vm6215_vm3, %v571_v12, %v6042_v36 }
  0x4d   : > { %vm7578_vm10 = vcmp.ne.s32.totalorder %v6053_v10, 0  ;;  %vm7579_vm12 = vcmp.lt.s32.totalorder %v6053_v10, 0  ;;  %v590_v27 = vsel %vm6235_vm8, %v572_v13, %v6050_v40  ;;  %vm6262_vm11 = vcmp.lt.s32.totalorder %v578_v22, 16 }
  0x4e   : > { %vm6255_vm0 = vmand %vm7579_vm12, %vm7578_vm10  ;;  %vm6266_vm4 = vcmp.lt.s32.totalorder %v579_v23, 16  ;;  %vm6270_vm9 = vcmp.lt.s32.totalorder %v580_v6, 16  ;;  %vm7588_vm2 = vcmp.ne.s32.totalorder %v6057_v43, 0  ;;  %vm6285_vm15 = vcmp.lt.s32.totalorder %v581_v24, 16 }
  0x4f   : > { %vm6278_vm14 = vmand %vm538_vm1, %vm7588_vm2  ;;  %v591_v9 = vsel %vm6255_vm0, %v573_v14, %v6053_v10  ;;  %vm6289_vm13 = vcmp.lt.s32.totalorder %v582_v48, 16  ;;  %vm6293_vm6 = vcmp.lt.s32.totalorder %v583_v49, 16  ;;  %vm7597_vm1 = vcmp.ne.s32.totalorder %v6060_v33, 0 }
  0x50   : > { %vm7598_vm3 = vcmp.lt.s32.totalorder %v6060_v33, 0  ;;  %v592_v39 = vsel %vm6278_vm14, %v574_v5, %v6057_v43  ;;  %vm6308_vm7 = vcmp.lt.s32.totalorder %v584_v50, 16  ;;  %v7601_v40 = vmov 0 }
  0x51   : > { %vm6301_vm5 = vmand %vm7598_vm3, %vm7597_vm1  ;;  %v7602_v40 = vsel %vm6308_vm7, 4294967295, %v7601_v40  ;;  %vm6312_vm8 = vcmp.lt.s32.totalorder %v585_v57, 16  ;;  %v7603_v10 = vmov 0  ;;  %vm6316_vm10 = vcmp.lt.s32.totalorder %v586_v1, 16 }
  0x52   : > { %v7604_v10 = vsel %vm6312_vm8, 4294967295, %v7603_v10  ;;  %v7605_v25 = vmov 0  ;;  %vm7607_vm12 = vcmp.ne.s32.totalorder %v6080_v42, 0  ;;  %vm7608_vm0 = vcmp.lt.s32.totalorder %v6080_v42, 0 }
  0x53   : > { %v7606_v25 = vsel %vm6316_vm10, 4294967295, %v7605_v25  ;;  %vm558_vm2 = vmand %vm7608_vm0, %vm7607_vm12  ;;  %v593_v43 = vsel %vm6301_vm5, %v575_v17, %v6060_v33  ;;  %vm6327_vm14 = vcmp.lt.s32.totalorder %v587_v15, 16  ;;  %v7609_v37 = vmov 0  ;;  %617 = sbr.rel (%p3894_p6) target bundleno = 91 (0x5b), region = 44 }
  0x54   : > { %v7610_v37 = vsel %vm6327_vm14, 4294967295, %v7609_v37  ;;  %vm6331_vm1 = vcmp.lt.s32.totalorder %v588_v18, 16  ;;  %v7611_v41 = vmov 0  ;;  %vm6335_vm3 = vcmp.lt.s32.totalorder %v589_v26, 16 }
  0x55   : > { %v7612_v41 = vsel %vm6331_vm1, 4294967295, %v7611_v41  ;;  %v7613_v44 = vmov 0  ;;  %vm7615_vm10 = vcmp.ne.s32.totalorder %v6115_v52, 0  ;;  %vm7616_vm12 = vcmp.lt.s32.totalorder %v6115_v52, 0 }
  0x56   : > { %v7614_v44 = vsel %vm6335_vm3, 4294967295, %v7613_v44  ;;  %vm559_vm0 = vmand %vm7616_vm12, %vm7615_vm10  ;;  %v594_v45 = vsel %vm558_vm2, %v576_v19, %v6080_v42  ;;  %vm6344_vm5 = vcmp.lt.s32.totalorder %v590_v27, 16  ;;  %vm6348_vm14 = vcmp.lt.s32.totalorder %v591_v9, 16 }
  0x57   : > { %vm6352_vm1 = vcmp.lt.s32.totalorder %v592_v39, 16  ;;  %v595_v53 = vsel %vm559_vm0, %v577_v20, %v6115_v52  ;;  %vm6357_vm3 = vcmp.lt.s32.totalorder %v593_v43, 16  ;;  %v7623_v47 = vmov 0 }
  0x58   : > { %v7624_v47 = vsel %vm6357_vm3, 4294967295, %v7623_v47  ;;  %vm6361_vm10 = vcmp.lt.s32.totalorder %v594_v45, 16  ;;  %vm6365_vm2 = vcmp.lt.s32.totalorder %v595_v53, 16  ;;  %v7627_v54 = vmov 0 }
  0x59   : > { %v7628_v54 = vsel %vm6365_vm2, 4294967295, %v7627_v54  ;;  %v5728_v52 = vmov (!%p3894_p6), 0.0  }
  0x5a   : > { %618 = vst [vmem:[%s6374_s19] sm:$0x1] %v5728_v52 }
  0x5b PF: > { %s7630_s1 = sld [smem:[#allocation14_spill]]  ;;  %v5729_v56 = vmov 0.0   ;;  %v5444_v58 = vld [vmem:[%s7502_s2 + $0x100] sm:$0xff]   ;;  %vm7519_vm12 = vmmov 0   ;;  %v5446_v60 = vld [vmem:[%s7502_s2 + $0x108] sm:$0xff]   ;;  %v5448_v62 = vld [vmem:[%s7502_s2 + $0x110] sm:$0xff]  }
  0x5c   : > { %4507 = vmatprep.subr.bf16.mxu0 %v5729_v56  ;;  %4767 = vmatprep.subr.bf16.mxu1 %v5729_v56  ;;  %v5450_v0 = vld [vmem:[%s7502_s2 + $0x118] sm:$0xff]   ;;  %v5452_v3 = vld [vmem:[%s7502_s2 + $0x120] sm:$0xff]   ;;  %v5459_v11 = vld [vmem:[%s5926_s11 + $0x8] sm:$0xfe]   ;;  %vm702_vm0 = vsmask.f32 6400 }
  0x5d   : > { %4523 = vmatprep.mubr.msk.bf16.mxu0 %vm7519_vm12, %v5729_v56  ;;  %4768 = vmatpush3.bf16.msra.mxu1 %v5444_v58  ;;  %v5460_v12 = vld [vmem:[%s5926_s11 + $0x10] sm:$0xff]   ;;  %v5454_v13 = vld [vmem:[%s7502_s2 + $0x128] sm:$0xff]   ;;  %v704_v5 = vshrl.u32 %v5459_v11, 16  ;;  %v707_v17 = vshll.u32 %v5459_v11, 16  ;;  %v5465_v8 = vld [vmem:[%s5926_s11 + $0x18] sm:$0xff]   ;;  %s5336_s0 = smul.u32 36, %s5710_s27 }
  0x5e   : > { %4769 = vmatprep.subr.bf16.mxu1 %v5729_v56  ;;  %4783 = vmatprep.mubr.msk.bf16.mxu1 %vm7519_vm12, %v5729_v56  ;;  %v1930_v14 = vld [vmem:[%s5926_s11 + $0x8] sm:$0xe]  ;;  %v6432_v16 = vld [vmem:[%s5926_s11 + $0xc] sm:$0xf]  ;;  %v712_v19 = vshrl.u32 %v5460_v12, 16  ;;  %v715_v20 = vshll.u32 %v5460_v12, 16 }
  0x5f   : > { %v6437_v21 = vcombine.low %v1930_v14, %v6432_v16  ;;  %v6440_v22 = vld [vmem:[%s5926_s11 + $0x10] sm:$0xff]   ;;  %v706_v23 = vrot.slane %v704_v5, 1  ;;  %v709_v6 = vrot.slane %v707_v17, 2  ;;  %v6459_v39 = vld [vmem:[%s5926_s11 + $0x18] sm:$0xff]   ;;  %v721_v52 = vshrl.u32 %v5465_v8, 16  ;;  %v6479_v12 = vld [vmem:[%s5926_s11 + $0x20] sm:$0xff]  }
  0x60   : > { %v714_v24 = vrot.slane %v712_v19, 1  ;;  %v717_v7 = vrot.slane %v715_v20, 2  ;;  %v5456_v49 = vld [vmem:[%s7502_s2 + $0x130] sm:$0xff]   ;;  %v2243_v28 = vshrl.u32 %v6440_v22, 16  ;;  %v2246_v1 = vshll.u32 %v6440_v22, 16  ;;  %v5458_v43 = vld [vmem:[%s7502_s2 + $0x138] sm:$0xff]  }
  0x61   : > { %v5443_v55 = vld [vmem:[%s7630_s1] sm:$0xff]   ;;  %v5445_v59 = vld [vmem:[%s7630_s1 + $0x8] sm:$0xff]   ;;  %v5447_v61 = vld [vmem:[%s7630_s1 + $0x10] sm:$0xff]   ;;  %4770 = vmatpush3.bf16.msra.mxu1 %v5446_v60  ;;  %v2235_v50 = vshrl.u32 %v6437_v21, 16  ;;  %v2238_v57 = vshll.u32 %v6437_v21, 16  ;;  %v710_v9 = vor.u32 %v709_v6, %v706_v23  ;;  %v2252_v58 = vshrl.u32 %v6459_v39, 16 }
  0x62   : > { %4508 = vmatpush3.bf16.msra.mxu0 %v5443_v55  ;;  %4771 = vmatprep.subr.bf16.mxu1 %v5729_v56  ;;  %v5449_v63 = vld [vmem:[%s7630_s1 + $0x18] sm:$0xff]   ;;  %v5451_v2 = vld [vmem:[%s7630_s1 + $0x20] sm:$0xff]   ;;  %v5453_v4 = vld [vmem:[%s7630_s1 + $0x28] sm:$0xff]   ;;  %v2245_v29 = vrot.slane %v2243_v28, 1  ;;  %v2248_v27 = vrot.slane %v2246_v1, 2  ;;  %v718_v38 = vor.u32 %v717_v7, %v714_v24  ;;  %v724_v55 = vshll.u32 %v5465_v8, 16 }
  0x63   : > { %4509 = vmatprep.subr.bf16.mxu0 %v5729_v56  ;;  %v5455_v48 = vld [vmem:[%s7630_s1 + $0x30] sm:$0xff]   ;;  %v5457_v15 = vld [vmem:[%s7630_s1 + $0x38] sm:$0xff]   ;;  %v2237_v18 = vrot.slane %v2235_v50, 1  ;;  %v2240_v26 = vrot.slane %v2238_v57, 2  ;;  %v5463_v60 = vld [vmem:[%s7502_s2 + $0x40] sm:$0xff]   ;;  %v2261_v23 = vshrl.u32 %v6479_v12, 16 }
  0x64   : > { %v2249_v53 = vor.u32 %v2248_v27, %v2245_v29  ;;  %v5468_v17 = vld [vmem:[%s7502_s2 + $0x148] sm:$0xff]   ;;  %v2264_v6 = vshll.u32 %v6479_v12, 16  ;;  %v5471_v7 = vld [vmem:[%s7502_s2 + $0x50] sm:$0xff]   ;;  %vm1308_vm2 = vsmask.f32 7424  ;;  %s5337_s30 = smul.u32 72, %s5714_s28 }
  0x65   : > { %4772 = vmatpush3.bf16.msra.mxu1 %v5448_v62  ;;  %v2241_v45 = vor.u32 %v2240_v26, %v2237_v18  ;;  %v719_v62 = vsel %vm702_vm0, %v710_v9, %v718_v38  ;;  %v6502_v57 = vld [vmem:[%s5926_s11 + $0x28] sm:$0xff]   ;;  %v2263_v1 = vrot.slane %v2261_v23, 1  ;;  %v5472_v18 = vld [vmem:[%s7502_s2 + $0x150] sm:$0xff]   ;;  %v5481_v23 = vld [vmem:[%s5926_s11 + $0x38] sm:$0xff]   ;;  %s3762_s10 = sshll.u32 %s6370_s13, 4  ;;  %s7651_s16 = sand.u32 1, %s5702_s25   ;;  %s7390_s10 = int_to_ptr.vmem [resolvable:$true] %s3762_s10 }
  0x66   : > { %4510 = vmatpush3.bf16.msra.mxu0 %v5445_v59  ;;  %4773 = vmatprep.subr.bf16.mxu1 %v5729_v56  ;;  %v2255_v59 = vshll.u32 %v6459_v39, 16  ;;  %v2270_v8 = vshrl.u32 %v6502_v57, 16  ;;  %s3759_s27 = sadd.s32 %s5337_s30, %s5336_s0  ;;  %s7402_s12 = scalar_lea.sflag [#allocation3], %s7651_s16 }
  0x67   : > { %4511 = vmatprep.subr.bf16.mxu0 %v5729_v56  ;;  %s4190_s17 = sshll.u32 %s3759_s27, 6  ;;  %s5576_s0 = scalar_lea.vmem %s7390_s10, 2304 }
  0x68   : > { %v2257_v11 = vrot.slane %v2255_v59, 2  ;;  %v2272_v59 = vrot.slane %v2270_v8, 1  ;;  %v5492_v8 = vld [vmem:[%s7502_s2 + $0x78] sm:$0xff]   ;;  %s7397_s20 = scalar_lea.hbm %s7505_s5, %s4190_s17  ;;  %p5577_p8 = scmp.ne.s32.totalorder %s7390_s10, %s5576_s0 }
  0x69   : > { %4774 = vmatpush3.bf16.msra.mxu1 %v5450_v0  ;;  %v726_v0 = vrot.slane %v724_v55, 2  ;;  %s5731_s30 = smov [#allocation2]  }
  0x6a   : > { %4512 = vmatpush3.bf16.msra.mxu0 %v5447_v61  ;;  %4775 = vmatprep.subr.bf16.mxu1 %v5729_v56  ;;  %v5469_v61 = vld [vmem:[%s5926_s11 + $0x20] sm:$0xff]   ;;  %p5578_p9 = pnand %p5577_p8, %p5843_p3  ;;  %s5580_s27 = sshll.u32 %s5731_s30, 4  ;;  %s5581_s27 = int_to_ptr.vmem [resolvable:$false] %s5580_s27 }
  0x6b   : > { %4513 = vmatprep.subr.bf16.mxu0 %v5729_v56  ;;  %v730_v14 = vshrl.u32 %v5469_v61, 16  ;;  %v733_v19 = vshll.u32 %v5469_v61, 16  ;;  %s5582_s1 = scalar_lea.vmem %s5581_s27, 4608  ;;  %p5583_p11 = scmp.lt.s32.totalorder %s7390_s10, %s5581_s27 }
  0x6c   : > { %p5579_p10 = pneg %p5578_p9  ;;  %p5584_p0 = scmp.lt.s32.totalorder %s5582_s1, %s5576_s0 }
  0x6d   : > { %4776 = vmatpush3.bf16.msra.mxu1 %v5452_v3  ;;  %v5464_v3 = vld [vmem:[%s7502_s2 + $0x140] sm:$0xff]   ;;  %v732_v24 = vrot.slane %v730_v14, 1  ;;  %v735_v50 = vrot.slane %v733_v19, 2 }
  0x6e   : > { %4514 = vmatpush3.bf16.msra.mxu0 %v5449_v63  ;;  %4777 = vmatprep.subr.bf16.mxu1 %v5729_v56  ;;  %v723_v63 = vrot.slane %v721_v52, 1  ;;  %p5585_p1 = por %p5584_p0, %p5583_p11 }
  0x6f   : > { %4515 = vmatprep.subr.bf16.mxu0 %v5729_v56  ;;  %v736_v29 = vor.u32 %v735_v50, %v732_v24  ;;  %v5487_v50 = vld [vmem:[%s7502_s2 + $0x70] sm:$0xff]  }
  0x70   : > { %v727_v5 = vor.u32 %v726_v0, %v723_v63  ;;  %v5479_v63 = vld [vmem:[%s7502_s2 + $0x60] sm:$0xff]   ;;  %p5586_p4 = pnand %p5585_p1, %p5579_p10 }
  0x71   : > { %4778 = vmatpush3.bf16.msra.mxu1 %v5454_v13  ;;  %v5467_v13 = vld [vmem:[%s7502_s2 + $0x48] sm:$0xff]   ;;  %v5480_v0 = vld [vmem:[%s7502_s2 + $0x160] sm:$0xff]  }
  0x72   : > { %4516 = vmatpush3.bf16.msra.mxu0 %v5451_v2  ;;  %4779 = vmatprep.subr.bf16.mxu1 %v5729_v56  ;;  %v2250_v2 = vsel %vm702_vm0, %v2241_v45, %v2249_v53  ;;  %v5476_v45 = vld [vmem:[%s7502_s2 + $0x158] sm:$0xff]   ;;  %v737_v52 = vsel %vm702_vm0, %v727_v5, %v736_v29 }
  0x73   : > { %4517 = vmatprep.subr.bf16.mxu0 %v5729_v56 }
  0x75   : > { %4780 = vmatpush3.bf16.msra.mxu1 %v5456_v49  ;;  %v728_v49 = vsel %vm702_vm0, %v718_v38, %v727_v5  ;;  %v2273_v38 = vshll.u32 %v6502_v57, 16  ;;  %v5483_v5 = vld [vmem:[%s7502_s2 + $0x68] sm:$0xff]  }
  0x76   : > { %4518 = vmatpush3.bf16.msra.mxu0 %v5453_v4  ;;  %4781 = vmatprep.subr.bf16.mxu1 %v5729_v56  ;;  %v2254_v4 = vrot.slane %v2252_v58, 1 }
  0x77   : > { %4519 = vmatprep.subr.bf16.mxu0 %v5729_v56 }
  0x78   : > { %v2258_v20 = vor.u32 %v2257_v11, %v2254_v4 }
  0x79   : > { %4782 = vmatpush3.bf16.msra.mxu1 %v5458_v43  ;;  %v5475_v43 = vld [vmem:[%s7502_s2 + $0x58] sm:$0xff]  }
  0x7a   : > { %4520 = vmatpush3.bf16.msra.mxu0 %v5455_v48  ;;  %4819 = vmatprep.subr.bf16.mxu1 %v5729_v56  ;;  %v5473_v48 = vld [vmem:[%s5926_s11 + $0x28] sm:$0xff]   ;;  %v2259_v28 = vsel %vm702_vm0, %v2249_v53, %v2258_v20  ;;  %v5477_v53 = vld [vmem:[%s5926_s11 + $0x30] sm:$0xff]  }
  0x7b   : > { %4521 = vmatprep.subr.bf16.mxu0 %v5729_v56  ;;  %v739_v26 = vshrl.u32 %v5473_v48, 16  ;;  %v742_v27 = vshll.u32 %v5473_v48, 16 }
  0x7c   : > { %4784 = vmatmul.mubr.bf16.vlgmr.msra.gmra.mrb[0].mxu1 %v2250_v2  ;;  %v748_v2 = vshrl.u32 %v5477_v53, 16 }
  0x7d   : > { %4820 = vmatpush3.bf16.msra.mxu1 %v5464_v3  ;;  %4787 = vmatprep.mubr.msk.bf16.mxu1 %vm7519_vm12, %v5729_v56  ;;  %v741_v55 = vrot.slane %v739_v26, 1  ;;  %v744_v58 = vrot.slane %v742_v27, 2  ;;  %v751_v3 = vshll.u32 %v5477_v53, 16 }
  0x7e   : > { %4522 = vmatpush3.bf16.msra.mxu0 %v5457_v15  ;;  %4821 = vmatprep.subr.bf16.mxu1 %v5729_v56  ;;  %v2266_v15 = vrot.slane %v2264_v6, 2  ;;  %v750_v19 = vrot.slane %v748_v2, 1  ;;  %v6553_v6 = vld [vmem:[%s5926_s11 + $0x38] sm:$0xff]  }
  0x7f   : > { %4559 = vmatprep.subr.bf16.mxu0 %v5729_v56  ;;  %v745_v4 = vor.u32 %v744_v58, %v741_v55  ;;  %v2288_v26 = vshrl.u32 %v6553_v6, 16  ;;  %v2291_v27 = vshll.u32 %v6553_v6, 16 }
  0x80   : > { %v2267_v9 = vor.u32 %v2266_v15, %v2263_v1  ;;  %v757_v15 = vshrl.u32 %v5481_v23, 16 }
  0x81   : > { %4524 = vmatmul.mubr.bf16.vlgmr.msra.gmra.mrb[0].mxu0 %v719_v62  ;;  %4822 = vmatpush3.bf16.msra.mxu1 %v5468_v17  ;;  %v2275_v62 = vrot.slane %v2273_v38, 2  ;;  %v5484_v17 = vld [vmem:[%s7502_s2 + $0x168] sm:$0xff]   ;;  %v746_v24 = vsel %vm702_vm0, %v736_v29, %v745_v4  ;;  %v5485_v38 = vld [vmem:[%s5926_s11 + $0x40] sm:$0xff]   ;;  %v2290_v58 = vrot.slane %v2288_v26, 1 }
  0x82   : > { %4560 = vmatpush3.bf16.msra.mxu0 %v5463_v60  ;;  %4527 = vmatprep.mubr.msk.bf16.mxu0 %vm7519_vm12, %v5729_v56  ;;  %v6527_v60 = vld [vmem:[%s5926_s11 + $0x30] sm:$0xff]   ;;  %v2268_v61 = vsel %vm702_vm0, %v2258_v20, %v2267_v9  ;;  %v753_v20 = vrot.slane %v751_v3, 2 }
  0x83   : > { %4561 = vmatprep.subr.bf16.mxu0 %v5729_v56  ;;  %4823 = vmatprep.subr.bf16.mxu1 %v5729_v56  ;;  %v2276_v11 = vor.u32 %v2275_v62, %v2272_v59  ;;  %v2282_v14 = vshll.u32 %v6527_v60, 16  ;;  %v2293_v59 = vrot.slane %v2291_v27, 2  ;;  %v6609_v26 = vld [vmem:[%s5926_s11 + $0x50] ss:$0 sps:$4 sm:$0x33]  }
  0x84   : > { %4788 = vmatmul.mubr.bf16.gmra.mrb[4].mxu1 %v2259_v28  ;;  %v5488_v28 = vld [vmem:[%s7502_s2 + $0x170] sm:$0xff]   ;;  %v754_v1 = vor.u32 %v753_v20, %v750_v19  ;;  %v6598_v20 = vld [vmem:[%s5926_s11 + $0x48] sm:$0xff]  }
  0x85   : > { %4791 = vmatprep.mubr.msk.bf16.mxu1 %vm7519_vm12, %v5729_v56  ;;  %4824 = vmatpush3.bf16.msra.mxu1 %v5472_v18  ;;  %v760_v18 = vshll.u32 %v5481_v23, 16  ;;  %v2294_v3 = vor.u32 %v2293_v59, %v2290_v58  ;;  %v2315_v58 = vshrl.u32 %v6609_v26, 16  ;;  %v2318_v59 = vshll.u32 %v6609_v26, 16 }
  0x86   : > { %4562 = vmatpush3.bf16.msra.mxu0 %v5467_v13  ;;  %4825 = vmatprep.subr.bf16.mxu1 %v5729_v56  ;;  %v2279_v13 = vshrl.u32 %v6527_v60, 16 }
  0x87   : > { %4563 = vmatprep.subr.bf16.mxu0 %v5729_v56  ;;  %v762_v53 = vrot.slane %v760_v18, 2 }
  0x88   : > { %v2281_v48 = vrot.slane %v2279_v13, 1 }
  0x89   : > { %4528 = vmatmul.mubr.bf16.gmra.mrb[4].mxu0 %v728_v49  ;;  %4826 = vmatpush3.bf16.msra.mxu1 %v5476_v45  ;;  %v2284_v49 = vrot.slane %v2282_v14, 2  ;;  %v759_v45 = vrot.slane %v757_v15, 1 }
  0x8a   : > { %4531 = vmatprep.mubr.msk.bf16.mxu0 %vm7519_vm12, %v5729_v56  ;;  %4564 = vmatpush3.bf16.msra.mxu0 %v5471_v7  ;;  %v2277_v7 = vsel %vm702_vm0, %v2267_v9, %v2276_v11  ;;  %v5494_v9 = vld [vmem:[%s7502_s2 + $0x178] sm:$0xff]  }
  0x8b   : > { %4565 = vmatprep.subr.bf16.mxu0 %v5729_v56  ;;  %4827 = vmatprep.subr.bf16.mxu1 %v5729_v56  ;;  %v2285_v29 = vor.u32 %v2284_v49, %v2281_v48  ;;  %v763_v62 = vor.u32 %v762_v53, %v759_v45  ;;  %v2306_v49 = vshrl.u32 %v6598_v20, 16  ;;  %v6616_v53 = vld [vmem:[%s5926_s11 + $0x4] sm:$0xf] }
  0x8c   : > { %4792 = vmatmul.mubr.bf16.gmra.mrb[8].mxu1 %v2268_v61  ;;  %v766_v61 = vshrl.u32 %v5485_v38, 16 }
  0x8d   : > { %4795 = vmatprep.mubr.msk.bf16.mxu1 %vm7519_vm12, %v5729_v56  ;;  %4828 = vmatpush3.bf16.msra.mxu1 %v5480_v0  ;;  %v2286_v55 = vsel %vm702_vm0, %v2276_v11, %v2285_v29  ;;  %v764_v13 = vsel %vm702_vm0, %v754_v1, %v763_v62  ;;  %v2308_v27 = vrot.slane %v2306_v49, 1 }
  0x8e   : > { %4566 = vmatpush3.bf16.msra.mxu0 %v5475_v43  ;;  %4829 = vmatprep.subr.bf16.mxu1 %v5729_v56  ;;  %v755_v43 = vsel %vm702_vm0, %v745_v4, %v754_v1  ;;  %v5489_v4 = vld [vmem:[%s5926_s11 + $0x48] sm:$0xff]   ;;  %v768_v11 = vrot.slane %v766_v61, 1  ;;  %v5491_v1 = vld [vmem:[%s5926_s11 + $0x50] ss:$0 sps:$4 sm:$0x33]  }
  0x8f   : > { %4567 = vmatprep.subr.bf16.mxu0 %v5729_v56  ;;  %v775_v23 = vshrl.u32 %v5489_v4, 16 }
  0x91   : > { %4532 = vmatmul.mubr.bf16.gmra.mrb[8].mxu0 %v737_v52  ;;  %4830 = vmatpush3.bf16.msra.mxu1 %v5484_v17  ;;  %v6583_v52 = vld [vmem:[%s5926_s11 + $0x40] sm:$0xff]   ;;  %v2295_v17 = vsel %vm702_vm0, %v2285_v29, %v2294_v3 }
  0x92   : > { %4535 = vmatprep.mubr.msk.bf16.mxu0 %vm7519_vm12, %v5729_v56  ;;  %4568 = vmatpush3.bf16.msra.mxu0 %v5479_v63  ;;  %v769_v63 = vshll.u32 %v5485_v38, 16  ;;  %v2297_v0 = vshrl.u32 %v6583_v52, 16  ;;  %v2300_v2 = vshll.u32 %v6583_v52, 16  ;;  %v787_v38 = vshll.u32 %v5491_v1, 16 }
  0x93   : > { %4569 = vmatprep.subr.bf16.mxu0 %v5729_v56  ;;  %4831 = vmatprep.subr.bf16.mxu1 %v5729_v56 }
  0x94   : > { %4796 = vmatmul.mubr.bf16.gmra.mrb[12].mxu1 %v2277_v7  ;;  %v771_v14 = vrot.slane %v769_v63, 2  ;;  %v2302_v19 = vrot.slane %v2300_v2, 2  ;;  %v778_v7 = vshll.u32 %v5489_v4, 16  ;;  %v789_v63 = vrot.slane %v787_v38, 2  ;;  %v5499_v38 = vld [vmem:[%s7502_s2 + $0x180] sm:$0xff]  }
  0x95   : > { %4799 = vmatprep.mubr.msk.bf16.mxu1 %vm7519_vm12, %v5729_v56  ;;  %4832 = vmatpush3.bf16.msra.mxu1 %v5488_v28  ;;  %v777_v28 = vrot.slane %v775_v23, 1  ;;  %v2320_v4 = vrot.slane %v2318_v59, 2  ;;  %v5502_v59 = vld [vmem:[%s7502_s2 + $0x188] sm:$0xff]  }
  0x96   : > { %4570 = vmatpush3.bf16.msra.mxu0 %v5483_v5  ;;  %4833 = vmatprep.subr.bf16.mxu1 %v5729_v56  ;;  %v2299_v5 = vrot.slane %v2297_v0, 1  ;;  %v780_v18 = vrot.slane %v778_v7, 2 }
  0x97   : > { %4571 = vmatprep.subr.bf16.mxu0 %v5729_v56 }
  0x98   : > { %v2303_v48 = vor.u32 %v2302_v19, %v2299_v5  ;;  %v781_v45 = vor.u32 %v780_v18, %v777_v28  ;;  %v2526_v18 = vrot.slane %v6440_v22, 2  ;;  %v5501_v22 = vld [vmem:[%s7502_s2 + $0x8] sm:$0xff]  }
  0x99   : > { %4536 = vmatmul.mubr.bf16.gmra.mrb[12].mxu0 %v746_v24  ;;  %4834 = vmatpush3.bf16.msra.mxu1 %v5494_v9  ;;  %v772_v24 = vor.u32 %v771_v14, %v768_v11  ;;  %v784_v9 = vshrl.u32 %v5491_v1, 16  ;;  %v6644_v1 = vld [vmem:[%s5926_s11 + $0x10] sm:$0xff]  }
  0x9a   : > { %4539 = vmatprep.mubr.msk.bf16.mxu0 %vm7519_vm12, %v5729_v56  ;;  %4572 = vmatpush3.bf16.msra.mxu0 %v5487_v50  ;;  %v2309_v50 = vshll.u32 %v6598_v20, 16  ;;  %v2304_v29 = vsel %vm702_vm0, %v2294_v3, %v2303_v48  ;;  %v2317_v3 = vrot.slane %v2315_v58, 1  ;;  %v2528_v58 = vrot.slane %v6459_v39, 2 }
  0x9b   : > { %4573 = vmatprep.subr.bf16.mxu0 %v5729_v56  ;;  %4871 = vmatprep.subr.bf16.mxu1 %v5729_v56  ;;  %v773_v15 = vsel %vm702_vm0, %v763_v62, %v772_v24  ;;  %v782_v61 = vsel %vm702_vm0, %v772_v24, %v781_v45  ;;  %v786_v62 = vrot.slane %v784_v9, 1 }
  0x9c   : > { %4800 = vmatmul.mubr.bf16.gmra.mrb[16].mxu1 %v2286_v55  ;;  %v2321_v5 = vor.u32 %v2320_v4, %v2317_v3  ;;  %v5505_v3 = vld [vmem:[%s7502_s2 + $0x190] sm:$0xff]   ;;  %v6688_v4 = vld [vmem:[%s5926_s11 + $0x20] sm:$0xff]  }
  0x9d   : > { %4803 = vmatprep.mubr.msk.bf16.mxu1 %vm7519_vm12, %v5729_v56  ;;  %v790_v11 = vor.u32 %v789_v63, %v786_v62  ;;  %v1329_v62 = vshrl.u32 %v6644_v1, 16 }
  0x9e   : > { %4574 = vmatpush3.bf16.msra.mxu0 %v5492_v8  ;;  %v2311_v8 = vrot.slane %v2309_v50, 2 }
  0x9f   : > { %4611 = vmatprep.subr.bf16.mxu0 %v5729_v56  ;;  %v791_v23 = vsel %vm702_vm0, %v781_v45, %v790_v11 }
  0xa0   : > { %v2312_v55 = vor.u32 %v2311_v8, %v2308_v27  ;;  %v1325_v8 = vshll.u32 %v6644_v1, 16 }
  0xa1   : > { %4540 = vmatmul.mubr.bf16.gmra.mrb[16].mxu0 %v755_v43  ;;  %v1208_v43 = vld [vmem:[%s5926_s11] sm:$0xf] }
  0xa2   : > { %4543 = vmatprep.mubr.msk.bf16.mxu0 %vm7519_vm12, %v5729_v56  ;;  %v6624_v0 = vcombine.low %v1208_v43, %v6616_v53  ;;  %v2313_v2 = vsel %vm702_vm0, %v2303_v48, %v2312_v55  ;;  %v2322_v48 = vsel %vm702_vm0, %v2312_v55, %v2321_v5  ;;  %vm2524_vm0 = vcmask 1045504   ;;  %v6663_v55 = vld [vmem:[%s5926_s11 + $0x18] sm:$0xff]  }
  0xa3   : > { %v1327_v45 = vrot.slane %v1325_v8, 1  ;;  %v1333_v63 = vshll.u32 %v6663_v55, 16  ;;  %v2529_v39 = vsel %vm2524_vm0, %v2526_v18, %v2528_v58  ;;  %v2530_v5 = vrot.slane %v6479_v12, 2  ;;  %v5516_v8 = vld [vmem:[%s7502_s2 + $0x30] sm:$0xff]  }
  0xa4   : > { %4804 = vmatmul.mubr.bf16.gmra.mrb[20].mxu1 %v2295_v17  ;;  %v1312_v14 = vshll.u32 %v6624_v0, 16  ;;  %v2503_v17 = vld [vmem:[%s5926_s11 + $0x8] sm:$0xc]  ;;  %v1310_v19 = vshrl.u32 %v6624_v0, 16  ;;  %v1337_v12 = vshrl.u32 %v6663_v55, 16 }
  0xa5   : > { %4807 = vmatprep.mubr.msk.bf16.mxu1 %vm7519_vm12, %v5729_v56  ;;  %v4075_v49 = vcombine.low %v2503_v17, %v6432_v16  ;;  %v5498_v16 = vld [vmem:[%s7502_s2] sm:$0xff]   ;;  %v1331_v11 = vor.u32 %v1329_v62, %v1327_v45  ;;  %v5507_v17 = vld [vmem:[%s7502_s2 + $0x18] sm:$0xff]  }
  0xa6   : > { %v1314_v24 = vrot.slane %v1312_v14, 1  ;;  %v1335_v14 = vrot.slane %v1333_v63, 1  ;;  %v5521_v62 = vld [vmem:[%s7502_s2 + $0x1b8] sm:$0xff]  }
  0xa8   : > { %v1315_v50 = vor.u32 %v1314_v24, %v1310_v19  ;;  %v1341_v19 = vshll.u32 %v6688_v4, 16  ;;  %v1336_v24 = vsel %vm1308_vm2, %v1331_v11, %v1335_v14 }
  0xa9   : > { %4544 = vmatmul.mubr.bf16.gmra.mrb[20].mxu0 %v764_v13  ;;  %v6630_v13 = vld [vmem:[%s5926_s11 + $0x8] sm:$0xff]  }
  0xaa   : > { %4547 = vmatprep.mubr.msk.bf16.mxu0 %vm7519_vm12, %v5729_v56  ;;  %v1317_v7 = vshll.u32 %v6630_v13, 16  ;;  %v1321_v27 = vshrl.u32 %v6630_v13, 16 }
  0xac   : > { %4808 = vmatmul.mubr.bf16.gmra.mrb[24].mxu1 %v2304_v29  ;;  %v1319_v28 = vrot.slane %v1317_v7, 1  ;;  %v2531_v7 = vsel %vm2524_vm0, %v2528_v58, %v2530_v5 }
  0xad   : > { %4811 = vmatprep.mubr.msk.bf16.mxu1 %vm7519_vm12, %v5729_v56 }
  0xae   : > { %v1320_v29 = vsel %vm1308_vm2, %v1315_v50, %v1319_v28  ;;  %v1323_v43 = vor.u32 %v1321_v27, %v1319_v28  ;;  %v2532_v50 = vrot.slane %v6502_v57, 2  ;;  %v6712_v28 = vld [vmem:[%s5926_s11 + $0x28] sm:$0xff]   ;;  %v1339_v57 = vor.u32 %v1337_v12, %v1335_v14  ;;  %v6768_v14 = vld [vmem:[%s5926_s11 + $0x38] sm:$0xff]  }
  0xaf   : > { %v1349_v27 = vshll.u32 %v6712_v28, 16 }
  0xb1   : > { %4548 = vmatmul.mubr.bf16.gmra.mrb[24].mxu0 %v773_v15  ;;  %v2525_v15 = vrot.slane %v4075_v49, 2  ;;  %v1343_v49 = vrot.slane %v1341_v19, 1 }
  0xb2   : > { %4551 = vmatprep.mubr.msk.bf16.mxu0 %vm7519_vm12, %v5729_v56 }
  0xb3   : > { %v2527_v9 = vsel %vm2524_vm0, %v2525_v15, %v2526_v18  ;;  %v5511_v15 = vld [vmem:[%s7502_s2 + $0x1a0] sm:$0xff]   ;;  %v5513_v18 = vld [vmem:[%s7502_s2 + $0x28] sm:$0xff]  }
  0xb4   : > { %4812 = vmatmul.mubr.bf16.gmra.mrb[28].mxu1 %v2313_v2  ;;  %v5504_v2 = vld [vmem:[%s7502_s2 + $0x10] sm:$0xff]  }
  0xb5   : > { %4815 = vmatprep.mubr.msk.bf16.mxu1 %vm7519_vm12, %v5729_v56 }
  0xb9   : > { %4552 = vmatmul.mubr.bf16.gmra.mrb[28].mxu0 %v782_v61  ;;  %v1328_v61 = vsel %vm1308_vm2, %v1323_v43, %v1327_v45  ;;  %v1351_v43 = vrot.slane %v1349_v27, 1  ;;  %v6743_v45 = vld [vmem:[%s5926_s11 + $0x30] sm:$0xff]  }
  0xba   : > { %4555 = vmatprep.mubr.msk.bf16.mxu0 %vm7519_vm12, %v5729_v56  ;;  %v1361_v19 = vshrl.u32 %v6743_v45, 16 }
  0xbc   : > { %4816 = vmatmul.mubr.bf16.gmra.mrb[32].mxu1 %v2322_v48  ;;  %v5510_v48 = vld [vmem:[%s7502_s2 + $0x20] sm:$0xff]  }
  0xbd   : > { %4835 = vmatprep.mubr.msk.bf16.mxu1 %vm7519_vm12, %v5729_v56 }
  0xc1   : > { %4556 = vmatmul.mubr.bf16.gmra.mrb[32].mxu0 %v791_v23  ;;  %v5508_v23 = vld [vmem:[%s7502_s2 + $0x198] sm:$0xff]  }
  0xc2   : > { %4575 = vmatprep.mubr.msk.bf16.mxu0 %vm7519_vm12, %v5729_v56 }
  0xc4   : > { %4836 = vmatmul.mubr.bf16.vlgmr.msra.gmra.mrb[0].mxu1 %v2527_v9  ;;  %v1344_v9 = vsel %vm1308_vm2, %v1339_v57, %v1343_v49 }
  0xc5   : > { %4872 = vmatpush3.bf16.msra.mxu1 %v5499_v38  ;;  %4839 = vmatprep.mubr.msk.bf16.mxu1 %vm7519_vm12, %v5729_v56  ;;  %v2533_v38 = vsel %vm2524_vm0, %v2530_v5, %v2532_v50  ;;  %v2536_v5 = vrot.slane %v6553_v6, 2  ;;  %v2538_v6 = vrot.slane %v6583_v52, 2  ;;  %v2540_v52 = vrot.slane %v6598_v20, 2 }
  0xc6   : > { %4873 = vmatprep.subr.bf16.mxu1 %v5729_v56  ;;  %v2542_v20 = vrot.slane %v6609_v26, 2 }
  0xc9   : > { %4576 = vmatmul.mubr.bf16.vlgmr.msra.gmra.mrb[36].mxu0 %v1320_v29  ;;  %4874 = vmatpush3.bf16.msra.mxu1 %v5502_v59  ;;  %v5514_v29 = vld [vmem:[%s7502_s2 + $0x1a8] sm:$0xff]   ;;  %v2534_v59 = vrot.slane %v6527_v60, 2  ;;  %v1357_v60 = vshll.u32 %v6743_v45, 16 }
  0xca   : > { %4612 = vmatpush3.bf16.msra.mxu0 %v5498_v16  ;;  %4579 = vmatprep.mubr.msk.bf16.mxu0 %vm7519_vm12, %v5729_v56  ;;  %v1345_v16 = vshrl.u32 %v6688_v4, 16 }
  0xcb   : > { %4613 = vmatprep.subr.bf16.mxu0 %v5729_v56  ;;  %4875 = vmatprep.subr.bf16.mxu1 %v5729_v56  ;;  %v1359_v11 = vrot.slane %v1357_v60, 1 }
  0xcc   : > { %4840 = vmatmul.mubr.bf16.gmra.mrb[4].mxu1 %v2529_v39  ;;  %v1347_v58 = vor.u32 %v1345_v16, %v1343_v49  ;;  %v1353_v39 = vshrl.u32 %v6712_v28, 16 }
  0xcd   : > { %4843 = vmatprep.mubr.msk.bf16.mxu1 %vm7519_vm12, %v5729_v56  ;;  %4876 = vmatpush3.bf16.msra.mxu1 %v5505_v3  ;;  %v1363_v12 = vor.u32 %v1361_v19, %v1359_v11 }
  0xce   : > { %4614 = vmatpush3.bf16.msra.mxu0 %v5501_v22  ;;  %4877 = vmatprep.subr.bf16.mxu1 %v5729_v56  ;;  %v5517_v22 = vld [vmem:[%s7502_s2 + $0x1b0] sm:$0xff]   ;;  %v1352_v63 = vsel %vm1308_vm2, %v1347_v58, %v1351_v43  ;;  %v1355_v3 = vor.u32 %v1353_v39, %v1351_v43  ;;  %v6816_v39 = vld [vmem:[%s5926_s11 + $0x18] sm:$0xff]  }
  0xcf   : > { %4615 = vmatprep.subr.bf16.mxu0 %v5729_v56  ;;  %v2724_v58 = vld [vmem:[%s5926_s11 + $0x10] sm:$0xc]  ;;  %v2809_v60 = vrot.slane %v6816_v39, 2 }
  0xd1   : > { %4580 = vmatmul.mubr.bf16.gmra.mrb[40].mxu0 %v1328_v61  ;;  %4878 = vmatpush3.bf16.msra.mxu1 %v5508_v23  ;;  %v5520_v61 = vld [vmem:[%s7502_s2 + $0x38] sm:$0xff]   ;;  %v1365_v23 = vshll.u32 %v6768_v14, 16 }
  0xd2   : > { %4583 = vmatprep.mubr.msk.bf16.mxu0 %vm7519_vm12, %v5729_v56  ;;  %4616 = vmatpush3.bf16.msra.mxu0 %v5504_v2  ;;  %v2535_v2 = vsel %vm2524_vm0, %v2532_v50, %v2534_v59  ;;  %v1369_v50 = vshrl.u32 %v6768_v14, 16 }
  0xd3   : > { %4617 = vmatprep.subr.bf16.mxu0 %v5729_v56  ;;  %4879 = vmatprep.subr.bf16.mxu1 %v5729_v56 }
  0xd4   : > { %4844 = vmatmul.mubr.bf16.gmra.mrb[8].mxu1 %v2531_v7  ;;  %v1367_v7 = vrot.slane %v1365_v23, 1  ;;  %v5528_v23 = vld [vmem:[%s7502_s2 + $0x1c8] sm:$0xff]  }
  0xd5   : > { %4847 = vmatprep.mubr.msk.bf16.mxu1 %vm7519_vm12, %v5729_v56  ;;  %4880 = vmatpush3.bf16.msra.mxu1 %v5511_v15 }
  0xd6   : > { %4618 = vmatpush3.bf16.msra.mxu0 %v5507_v17  ;;  %4881 = vmatprep.subr.bf16.mxu1 %v5729_v56  ;;  %v1360_v17 = vsel %vm1308_vm2, %v1355_v3, %v1359_v11  ;;  %v1368_v49 = vsel %vm1308_vm2, %v1363_v12, %v1367_v7  ;;  %v1371_v57 = vor.u32 %v1369_v50, %v1367_v7  ;;  %v5525_v11 = vld [vmem:[%s7502_s2 + $0x1c0] sm:$0xff]   ;;  %v5530_v12 = vld [vmem:[%s7502_s2 + $0x90] sm:$0xff]   ;;  %v5534_v50 = vld [vmem:[%s7502_s2 + $0x1d8] sm:$0xff]  }
  0xd7   : > { %4619 = vmatprep.subr.bf16.mxu0 %v5729_v56  ;;  %v5531_v7 = vld [vmem:[%s7502_s2 + $0x1d0] sm:$0xff]  }
  0xd9   : > { %4584 = vmatmul.mubr.bf16.gmra.mrb[44].mxu0 %v1336_v24  ;;  %4882 = vmatpush3.bf16.msra.mxu1 %v5514_v29  ;;  %v2537_v24 = vsel %vm2524_vm0, %v2534_v59, %v2536_v5  ;;  %v6792_v29 = vld [vmem:[%s5926_s11 + $0x48] ss:$0 sps:$4 sm:$0x11]   ;;  %v6808_v59 = vld [vmem:[%s5926_s11 + $0x14] sm:$0xf] }
  0xda   : > { %4587 = vmatprep.mubr.msk.bf16.mxu0 %vm7519_vm12, %v5729_v56  ;;  %4620 = vmatpush3.bf16.msra.mxu0 %v5510_v48  ;;  %v6780_v48 = vld [vmem:[%s5926_s11 + $0x40] sm:$0xff]  }
  0xdb   : > { %4621 = vmatprep.subr.bf16.mxu0 %v5729_v56  ;;  %4883 = vmatprep.subr.bf16.mxu1 %v5729_v56  ;;  %v1373_v15 = vshll.u32 %v6780_v48, 16 }
  0xdc   : > { %4848 = vmatmul.mubr.bf16.gmra.mrb[12].mxu1 %v2533_v38  ;;  %v2541_v38 = vsel %vm2524_vm0, %v2538_v6, %v2540_v52 }
  0xdd   : > { %4851 = vmatprep.mubr.msk.bf16.mxu1 %vm7519_vm12, %v5729_v56  ;;  %4884 = vmatpush3.bf16.msra.mxu1 %v5517_v22  ;;  %v1375_v16 = vrot.slane %v1373_v15, 1 }
  0xde   : > { %4622 = vmatpush3.bf16.msra.mxu0 %v5513_v18  ;;  %4885 = vmatprep.subr.bf16.mxu1 %v5729_v56  ;;  %v2539_v18 = vsel %vm2524_vm0, %v2536_v5, %v2538_v6  ;;  %v6832_v5 = vld [vmem:[%s5926_s11 + $0x20] sm:$0xff]  }
  0xdf   : > { %4623 = vmatprep.subr.bf16.mxu0 %v5729_v56  ;;  %v1376_v27 = vsel %vm1308_vm2, %v1371_v57, %v1375_v16  ;;  %v2811_v19 = vrot.slane %v6832_v5, 2  ;;  %v5536_v57 = vld [vmem:[%s7502_s2 + $0xa0] sm:$0xff]  }
  0xe1   : > { %4588 = vmatmul.mubr.bf16.gmra.mrb[48].mxu0 %v1344_v9  ;;  %4886 = vmatpush3.bf16.msra.mxu1 %v5521_v62  ;;  %v1381_v9 = vshll.u32 %v6792_v29, 16  ;;  %v2543_v62 = vsel %vm2524_vm0, %v2540_v52, %v2542_v20 }
  0xe2   : > { %4591 = vmatprep.mubr.msk.bf16.mxu0 %vm7519_vm12, %v5729_v56  ;;  %4624 = vmatpush3.bf16.msra.mxu0 %v5516_v8  ;;  %v1377_v8 = vshrl.u32 %v6780_v48, 16 }
  0xe3   : > { %4625 = vmatprep.subr.bf16.mxu0 %v5729_v56  ;;  %4923 = vmatprep.subr.bf16.mxu1 %v5729_v56  ;;  %v1383_v43 = vrot.slane %v1381_v9, 1 }
  0xe4   : > { %4852 = vmatmul.mubr.bf16.gmra.mrb[16].mxu1 %v2535_v2  ;;  %v1379_v22 = vor.u32 %v1377_v8, %v1375_v16  ;;  %v5524_v2 = vld [vmem:[%s7502_s2 + $0x80] sm:$0xff]   ;;  %v5540_v8 = vld [vmem:[%s7502_s2 + $0x1e8] sm:$0xff]  }
  0xe5   : > { %4855 = vmatprep.mubr.msk.bf16.mxu1 %vm7519_vm12, %v5729_v56  ;;  %v5537_v16 = vld [vmem:[%s7502_s2 + $0x1e0] sm:$0xff]  }
  0xe6   : > { %4626 = vmatpush3.bf16.msra.mxu0 %v5520_v61  ;;  %v1384_v61 = vsel %vm1308_vm2, %v1379_v22, %v1383_v43  ;;  %v5542_v22 = vld [vmem:[%s7502_s2 + $0xb0] sm:$0xff]   ;;  %vm7521_vm2 = vcmask 1046528  }
  0xe7   : > { %4663 = vmatprep.subr.bf16.mxu0 %v5729_v56  ;;  %v5543_v43 = vld [vmem:[%s7502_s2 + $0x1f0] sm:$0xff]  }
  0xe9   : > { %4592 = vmatmul.mubr.bf16.gmra.mrb[52].mxu0 %v1352_v63  ;;  %v6813_v63 = vcombine.low %v2724_v58, %v6808_v59  ;;  %v5545_v58 = vld [vmem:[%s7502_s2 + $0xb8] sm:$0xff]  }
  0xea   : > { %4595 = vmatprep.mubr.msk.bf16.mxu0 %vm7519_vm12, %v5729_v56 }
  0xeb   : > { %v2808_v26 = vrot.slane %v6813_v63, 2 }
  0xec   : > { %4856 = vmatmul.mubr.bf16.gmra.mrb[20].mxu1 %v2537_v24  ;;  %v6850_v24 = vld [vmem:[%s5926_s11 + $0x28] sm:$0xff]  }
  0xed   : > { %4859 = vmatprep.mubr.msk.bf16.mxu1 %vm7519_vm12, %v5729_v56  ;;  %v2810_v3 = vsel %vm2524_vm0, %v2808_v26, %v2809_v60  ;;  %v2813_v6 = vrot.slane %v6850_v24, 2  ;;  %v6928_v26 = vld [vmem:[%s5926_s11 + $0x40] sm:$0xff]  }
  0xef   : > { %v2814_v15 = vsel %vm2524_vm0, %v2811_v19, %v2813_v6 }
  0xf1   : > { %4596 = vmatmul.mubr.bf16.gmra.mrb[56].mxu0 %v1360_v17  ;;  %v5527_v17 = vld [vmem:[%s7502_s2 + $0x88] sm:$0xff]  }
  0xf2   : > { %4599 = vmatprep.mubr.msk.bf16.mxu0 %vm7519_vm12, %v5729_v56 }
  0xf4   : > { %4860 = vmatmul.mubr.bf16.gmra.mrb[24].mxu1 %v2539_v18  ;;  %v6876_v18 = vld [vmem:[%s5926_s11 + $0x30] sm:$0xff]  }
  0xf5   : > { %4863 = vmatprep.mubr.msk.bf16.mxu1 %vm7519_vm12, %v5729_v56  ;;  %v2815_v52 = vrot.slane %v6876_v18, 2 }
  0xf7   : > { %v2816_v9 = vsel %vm2524_vm0, %v2813_v6, %v2815_v52  ;;  %v1709_v6 = vld [vmem:[%s5926_s11] sm:$0xe] }
  0xf9   : > { %4600 = vmatmul.mubr.bf16.gmra.mrb[60].mxu0 %v1368_v49  ;;  %v5533_v49 = vld [vmem:[%s7502_s2 + $0x98] sm:$0xff]  }
  0xfa   : > { %4603 = vmatprep.mubr.msk.bf16.mxu0 %vm7519_vm12, %v5729_v56 }
  0xfc   : > { %4864 = vmatmul.mubr.bf16.gmra.mrb[28].mxu1 %v2541_v38  ;;  %v6902_v38 = vld [vmem:[%s5926_s11 + $0x38] sm:$0xff]  }
  0xfd   : > { %4867 = vmatprep.mubr.msk.bf16.mxu1 %vm7519_vm12, %v5729_v56  ;;  %v2817_v20 = vrot.slane %v6902_v38, 2 }
 0x101   : > { %4604 = vmatmul.mubr.bf16.gmra.mrb[64].mxu0 %v1376_v27  ;;  %v5539_v27 = vld [vmem:[%s7502_s2 + $0xa8] sm:$0xff]  }
 0x102   : > { %4607 = vmatprep.mubr.msk.bf16.mxu0 %vm7519_vm12, %v5729_v56 }
 0x104   : > { %4868 = vmatmul.mubr.bf16.gmra.mrb[32].mxu1 %v2543_v62  ;;  %v2818_v62 = vsel %vm2524_vm0, %v2815_v52, %v2817_v20  ;;  %v3991_v52 = vcombine.low %v1709_v6, %v6616_v53  ;;  %v3047_v53 = vshrl.u32 %v6832_v5, 16 }
 0x105   : > { %4887 = vmatprep.mubr.msk.bf16.mxu1 %vm7519_vm12, %v5729_v56 }
 0x109   : > { %4608 = vmatmul.mubr.bf16.gmra.mrb[68].mxu0 %v1384_v61  ;;  %v5547_v61 = vld [vmem:[%s7502_s2 + $0x1f8] sm:$0xff]  }
 0x10a   : > { %4627 = vmatprep.mubr.msk.bf16.mxu0 %vm7519_vm12, %v5729_v56 }
 0x10c   : > { %4888 = vmatmul.mubr.bf16.vlgmr.msra.gmra.mrb[0].mxu1 %v2810_v3  ;;  %v6940_v3 = vld [vmem:[%s5926_s11 + $0x48] sm:$0xff]  }
 0x10d   : > { %4924 = vmatpush3.bf16.msra.mxu1 %v5525_v11  ;;  %4891 = vmatprep.mubr.msk.bf16.mxu1 %vm7519_vm12, %v5729_v56  ;;  %v2821_v11 = vrot.slane %v6940_v3, 2 }
 0x10e   : > { %4925 = vmatprep.subr.bf16.mxu1 %v5729_v56 }
 0x111   : > { %4628 = vmatmul.mubr.bf16.vlgmr.msra.gmra.mrb[36].mxu0 %v6624_v0  ;;  %v2812_v0 = vsel %vm2524_vm0, %v2809_v60, %v2811_v19  ;;  %4926 = vmatpush3.bf16.msra.mxu1 %v5528_v23  ;;  %v2819_v60 = vrot.slane %v6928_v26, 2  ;;  %v6950_v19 = vld [vmem:[%s5926_s11 + $0x50] sm:$0xff]  }
 0x112   : > { %4664 = vmatpush3.bf16.msra.mxu0 %v5524_v2  ;;  %4631 = vmatprep.mubr.msk.bf16.mxu0 %vm7519_vm12, %v5729_v56  ;;  %v2823_v23 = vrot.slane %v6950_v19, 2 }
 0x113   : > { %4665 = vmatprep.subr.bf16.mxu0 %v5729_v56  ;;  %4927 = vmatprep.subr.bf16.mxu1 %v5729_v56  ;;  %v2820_v2 = vsel %vm2524_vm0, %v2817_v20, %v2819_v60  ;;  %v1732_v20 = vrot.slane %v6630_v13, 1 }
 0x114   : > { %4892 = vmatmul.mubr.bf16.gmra.mrb[4].mxu1 %v2812_v0  ;;  %v5546_v0 = vld [vmem:[%s5926_s11 + $0x58] ss:$0 sps:$4 sm:$0x33]  }
 0x115   : > { %4895 = vmatprep.mubr.msk.bf16.mxu1 %vm7519_vm12, %v5729_v56  ;;  %4928 = vmatpush3.bf16.msra.mxu1 %v5531_v7  ;;  %v2825_v7 = vrot.slane %v5546_v0, 2  ;;  %v5549_v0 = vld [vmem:[%s7502_s2 + $0xc0] sm:$0xff]  }
 0x116   : > { %4666 = vmatpush3.bf16.msra.mxu0 %v5527_v17  ;;  %4929 = vmatprep.subr.bf16.mxu1 %v5729_v56  ;;  %v2822_v17 = vsel %vm2524_vm0, %v2819_v60, %v2821_v11 }
 0x117   : > { %4667 = vmatprep.subr.bf16.mxu0 %v5729_v56 }
 0x119   : > { %4632 = vmatmul.mubr.bf16.gmra.mrb[40].mxu0 %v6630_v13  ;;  %4930 = vmatpush3.bf16.msra.mxu1 %v5534_v50  ;;  %v3033_v50 = vshll.u32 %v6813_v63, 16 }
 0x11a   : > { %4635 = vmatprep.mubr.msk.bf16.mxu0 %vm7519_vm12, %v5729_v56  ;;  %4668 = vmatpush3.bf16.msra.mxu0 %v5530_v12  ;;  %v2824_v12 = vsel %vm2524_vm0, %v2821_v11, %v2823_v23 }
 0x11b   : > { %4669 = vmatprep.subr.bf16.mxu0 %v5729_v56  ;;  %4931 = vmatprep.subr.bf16.mxu1 %v5729_v56 }
 0x11c   : > { %4896 = vmatmul.mubr.bf16.gmra.mrb[8].mxu1 %v2814_v15  ;;  %v3038_v15 = vshrl.u32 %v6816_v39, 16 }
 0x11d   : > { %4899 = vmatprep.mubr.msk.bf16.mxu1 %vm7519_vm12, %v5729_v56  ;;  %4932 = vmatpush3.bf16.msra.mxu1 %v5537_v16  ;;  %v2826_v16 = vsel %vm2524_vm0, %v2823_v23, %v2825_v7  ;;  %vm7517_vm0 = vsmask.f32 5376 }
 0x11e   : > { %4670 = vmatpush3.bf16.msra.mxu0 %v5533_v49  ;;  %4933 = vmatprep.subr.bf16.mxu1 %v5729_v56  ;;  %v3030_v49 = vshrl.u32 %v6813_v63, 16  ;;  %v1731_v63 = vrot.slane %v3991_v52, 1 }
 0x11f   : > { %4671 = vmatprep.subr.bf16.mxu0 %v5729_v56 }
 0x120   : > { %v1733_v23 = vsel %vm7521_vm2, %v1731_v63, %v1732_v20  ;;  %v3059_v63 = vshll.u32 %v6850_v24, 16 }
 0x121   : > { %4636 = vmatmul.mubr.bf16.gmra.mrb[44].mxu0 %v6644_v1  ;;  %4934 = vmatpush3.bf16.msra.mxu1 %v5540_v8  ;;  %v3035_v8 = vrot.slane %v3033_v50, 3 }
 0x122   : > { %4639 = vmatprep.mubr.msk.bf16.mxu0 %vm7519_vm12, %v5729_v56  ;;  %4672 = vmatpush3.bf16.msra.mxu0 %v5536_v57  ;;  %v3041_v57 = vshll.u32 %v6816_v39, 16 }
 0x123   : > { %4673 = vmatprep.subr.bf16.mxu0 %v5729_v56  ;;  %4935 = vmatprep.subr.bf16.mxu1 %v5729_v56 }
 0x124   : > { %4900 = vmatmul.mubr.bf16.gmra.mrb[12].mxu1 %v2816_v9  ;;  %v3040_v9 = vrot.slane %v3038_v15, 2 }
 0x125   : > { %4903 = vmatprep.mubr.msk.bf16.mxu1 %vm7519_vm12, %v5729_v56  ;;  %4936 = vmatpush3.bf16.msra.mxu1 %v5543_v43  ;;  %v6976_v43 = vld [vmem:[%s7503_s3] ss:$0 sm:$0xff] }
 0x126   : > { %4674 = vmatpush3.bf16.msra.mxu0 %v5539_v27  ;;  %4937 = vmatprep.subr.bf16.mxu1 %v5729_v56  ;;  %v3032_v27 = vrot.slane %v3030_v49, 2 }
 0x127   : > { %4675 = vmatprep.subr.bf16.mxu0 %v5729_v56 }
 0x129   : > { %4640 = vmatmul.mubr.bf16.gmra.mrb[48].mxu0 %v6663_v55  ;;  %4938 = vmatpush3.bf16.msra.mxu1 %v5547_v61  ;;  %v3036_v61 = vor.u32 %v3035_v8, %v3032_v27  ;;  %v1734_v27 = vrot.slane %v6644_v1, 1  ;;  %v5552_v1 = vld [vmem:[%s7502_s2 + $0x208] sm:$0xff]  }
 0x12a   : > { %4643 = vmatprep.mubr.msk.bf16.mxu0 %vm7519_vm12, %v5729_v56  ;;  %4676 = vmatpush3.bf16.msra.mxu0 %v5542_v22  ;;  %v3043_v22 = vrot.slane %v3041_v57, 3  ;;  %v5550_v57 = vld [vmem:[%s7502_s2 + $0x200] sm:$0xff]  }
 0x12b   : > { %4677 = vmatprep.subr.bf16.mxu0 %v5729_v56  ;;  %4975 = vmatprep.subr.bf16.mxu1 %v5729_v56 }
 0x12c   : > { %4904 = vmatmul.mubr.bf16.gmra.mrb[16].mxu1 %v2818_v62  ;;  %v3044_v62 = vor.u32 %v3043_v22, %v3040_v9  ;;  %v5551_v9 = vld [vmem:[%s7502_s2 + $0xc8] sm:$0xff]   ;;  %v3056_v22 = vshrl.u32 %v6850_v24, 16 }
 0x12d   : > { %4907 = vmatprep.mubr.msk.bf16.mxu1 %vm7519_vm12, %v5729_v56 }
 0x12e   : > { %4678 = vmatpush3.bf16.msra.mxu0 %v5545_v58  ;;  %v3050_v58 = vshll.u32 %v6832_v5, 16  ;;  %v3045_v15 = vsel %vm7517_vm0, %v3036_v61, %v3044_v62 }
 0x12f   : > { %4715 = vmatprep.subr.bf16.mxu0 %v5729_v56 }
 0x130   : > { %v3052_v7 = vrot.slane %v3050_v58, 3 }
 0x131   : > { %4644 = vmatmul.mubr.bf16.gmra.mrb[52].mxu0 %v6688_v4 }
 0x132   : > { %4647 = vmatprep.mubr.msk.bf16.mxu0 %vm7519_vm12, %v5729_v56 }
 0x134   : > { %4908 = vmatmul.mubr.bf16.gmra.mrb[20].mxu1 %v2820_v2  ;;  %v6988_v2 = vld [vmem:[%s7504_s4] ss:$0 sm:$0xff] }
 0x135   : > { %4911 = vmatprep.mubr.msk.bf16.mxu1 %vm7519_vm12, %v5729_v56 }
 0x139   : > { %4648 = vmatmul.mubr.bf16.gmra.mrb[56].mxu0 %v6712_v28 }
 0x13a   : > { %4651 = vmatprep.mubr.msk.bf16.mxu0 %vm7519_vm12, %v5729_v56 }
 0x13c   : > { %4912 = vmatmul.mubr.bf16.gmra.mrb[24].mxu1 %v2822_v17 }
 0x13d   : > { %4915 = vmatprep.mubr.msk.bf16.mxu1 %vm7519_vm12, %v5729_v56 }
 0x141   : > { %4652 = vmatmul.mubr.bf16.gmra.mrb[60].mxu0 %v6743_v45 }
 0x142   : > { %4655 = vmatprep.mubr.msk.bf16.mxu0 %vm7519_vm12, %v5729_v56 }
 0x144   : > { %4916 = vmatmul.mubr.bf16.gmra.mrb[28].mxu1 %v2824_v12  ;;  %v3049_v12 = vrot.slane %v3047_v53, 2 }
 0x145   : > { %4919 = vmatprep.mubr.msk.bf16.mxu1 %vm7519_vm12, %v5729_v56 }
 0x146   : > { %v3053_v8 = vor.u32 %v3052_v7, %v3049_v12  ;;  %v3058_v7 = vrot.slane %v3056_v22, 2 }
 0x148   : > { %v3054_v12 = vsel %vm7517_vm0, %v3044_v62, %v3053_v8 }
 0x149   : > { %4656 = vmatmul.mubr.bf16.gmra.mrb[64].mxu0 %v6768_v14 }
 0x14a   : > { %4659 = vmatprep.mubr.msk.bf16.mxu0 %vm7519_vm12, %v5729_v56 }
 0x14c   : > { %4920 = vmatmul.mubr.bf16.gmra.mrb[32].mxu1 %v2826_v16 }
 0x14d   : > { %4939 = vmatprep.mubr.msk.bf16.mxu1 %vm7519_vm12, %v5729_v56 }
 0x151   : > { %4660 = vmatmul.mubr.bf16.gmra.mrb[68].mxu0 %v6780_v48 }
 0x152   : > { %4679 = vmatprep.mubr.msk.bf16.mxu0 %vm7519_vm12, %v5729_v56 }
 0x154   : > { %v883_v60 = vpop.f32.mrb[0].mxu0  ;;  %4940 = vmatmul.mubr.bf16.vlgmr.msra.gmra.mrb[0].mxu1 %v3045_v15 }
 0x155   : > { %v961_v11 = vmul.f32 %v6976_v43, %v883_v60  ;;  %v4525_v13 = vpop.f32.mrb[1].mxu0  ;;  %4976 = vmatpush3.bf16.msra.mxu1 %v5550_v57  ;;  %4943 = vmatprep.mubr.msk.bf16.mxu1 %vm7519_vm12, %v5729_v56 }
 0x156   : > { %v886_v17 = vpop.f32.mrb[2].mxu0  ;;  %4977 = vmatprep.subr.bf16.mxu1 %v5729_v56 }
 0x157   : > { %v986_v6 = vadd.f32 %v6988_v2, %v961_v11  ;;  %v962_v49 = vmul.f32 %v6976_v43, %v886_v17  ;;  %v4526_v50 = vpop.f32.mrb[3].mxu0  ;;  %v1735_v17 = vsel %vm7521_vm2, %v1732_v20, %v1734_v27 }
 0x159   : > { %v1004_v16 = vmul.f32 0.2, %v986_v6  ;;  %v987_v52 = vadd.f32 %v6988_v2, %v962_v49  ;;  %4680 = vmatmul.mubr.bf16.vlgmr.msra.gmra.mrb[36].mxu0 %v1733_v23  ;;  %4978 = vmatpush3.bf16.msra.mxu1 %v5552_v1  ;;  %v3068_v1 = vshll.u32 %v6876_v18, 16 }
 0x15a   : > { %4716 = vmatpush3.bf16.msra.mxu0 %v5549_v0  ;;  %4683 = vmatprep.mubr.msk.bf16.mxu0 %vm7519_vm12, %v5729_v56 }
 0x15b   : > { %v1022_v53 = vmax.f32 %v986_v6, %v1004_v16  ;;  %v1005_v58 = vmul.f32 0.2, %v987_v52  ;;  %4717 = vmatprep.subr.bf16.mxu0 %v5729_v56  ;;  %v3061_v6 = vrot.slane %v3059_v63, 3  ;;  %v5553_v16 = vld [vmem:[%s7502_s2 + $0xd0] sm:$0xff]   ;;  %4979 = vmatprep.subr.bf16.mxu1 %v5729_v56  ;;  %v1736_v63 = vrot.slane %v6663_v55, 1  ;;  %v5555_v55 = vld [vmem:[%s7502_s2 + $0xd8] sm:$0xff]  }
 0x15c   : > { %v891_v61 = vpop.f32.mrb[4].mxu0  ;;  %4944 = vmatmul.mubr.bf16.gmra.mrb[4].mxu1 %v3054_v12 }
 0x15d   : > { %v1023_v60 = vmax.f32 %v987_v52, %v1005_v58  ;;  %v963_v11 = vmul.f32 %v6976_v43, %v891_v61  ;;  %v4529_v13 = vpop.f32.mrb[5].mxu0  ;;  %v1166_v23 = vsel %vm6262_vm11, %v1022_v53, 0.0  ;;  %v5554_v52 = vld [vmem:[%s7502_s2 + $0x210] sm:$0xff]   ;;  %v3065_v58 = vshrl.u32 %v6876_v18, 16  ;;  %4947 = vmatprep.mubr.msk.bf16.mxu1 %vm7519_vm12, %v5729_v56 }
 0x15e   : > { %v894_v0 = vpop.f32.mrb[6].mxu0  ;;  %4718 = vmatpush3.bf16.msra.mxu0 %v5551_v9  ;;  %4980 = vmatpush3.bf16.msra.mxu1 %v5554_v52  ;;  %v5556_v13 = vld [vmem:[%s7502_s2 + $0x218] sm:$0xff]  }
 0x15f   : > { %v4233_v49 = vpack.c.bf16 %v1023_v60, %v1022_v53  ;;  %v1167_v50 = vsel %vm6266_vm4, %v1023_v60, 0.0  ;;  %v988_v15 = vadd.f32 %v6988_v2, %v963_v11  ;;  %v964_v20 = vmul.f32 %v6976_v43, %v894_v0  ;;  %v4530_v57 = vpop.f32.mrb[7].mxu0  ;;  %4719 = vmatprep.subr.bf16.mxu0 %v5729_v56  ;;  %4981 = vmatprep.subr.bf16.mxu1 %v5729_v56 }
 0x160   : > { %v1184_v62 = vadd.f32 %v1167_v50, %v1166_v23  ;;  %v7039_v53 = vor.u32 %v3061_v6, %v3058_v7  ;;  %v1737_v7 = vsel %vm7521_vm2, %v1734_v27, %v1736_v63  ;;  %v5557_v27 = vld [vmem:[%s7502_s2 + $0xe0] sm:$0xff]  }
 0x161   : > { %4234 = vst [vmem:[%s6370_s13] sm:$0xff] %v4233_v49   ;;  %v1006_v9 = vmul.f32 0.2, %v988_v15  ;;  %v989_v22 = vadd.f32 %v6988_v2, %v964_v20  ;;  %4684 = vmatmul.mubr.bf16.gmra.mrb[40].mxu0 %v1735_v17  ;;  %v3070_v20 = vrot.slane %v3068_v1, 3 }
 0x162   : > { %4687 = vmatprep.mubr.msk.bf16.mxu0 %vm7519_vm12, %v5729_v56  ;;  %4720 = vmatpush3.bf16.msra.mxu0 %v5553_v16  ;;  %v3063_v50 = vsel %vm7517_vm0, %v3053_v8, %v7039_v53  ;;  %v5558_v8 = vld [vmem:[%s7502_s2 + $0x220] sm:$0xff]  }
 0x163   : > { %v1024_v61 = vmax.f32 %v988_v15, %v1006_v9  ;;  %v1007_v60 = vmul.f32 0.2, %v989_v22  ;;  %4721 = vmatprep.subr.bf16.mxu0 %v5729_v56  ;;  %v3067_v15 = vrot.slane %v3065_v58, 2  ;;  %4982 = vmatpush3.bf16.msra.mxu1 %v5556_v13 }
 0x164   : > { %v899_v11 = vpop.f32.mrb[8].mxu0  ;;  %4983 = vmatprep.subr.bf16.mxu1 %v5729_v56  ;;  %4948 = vmatmul.mubr.bf16.gmra.mrb[8].mxu1 %v3063_v50 }
 0x165   : > { %v1168_v17 = vsel %vm6270_vm9, %v1024_v61, 0.0  ;;  %v1025_v23 = vmax.f32 %v989_v22, %v1007_v60  ;;  %v965_v0 = vmul.f32 %v6976_v43, %v899_v11  ;;  %v4533_v12 = vpop.f32.mrb[9].mxu0  ;;  %v7076_v60 = vor.u32 %v3070_v20, %v3067_v15  ;;  %4951 = vmatprep.mubr.msk.bf16.mxu1 %vm7519_vm12, %v5729_v56 }
 0x166   : > { %v1185_v6 = vadd.f32 %v1184_v62, %v1168_v17  ;;  %v902_v49 = vpop.f32.mrb[10].mxu0  ;;  %4722 = vmatpush3.bf16.msra.mxu0 %v5555_v55  ;;  %v3074_v55 = vshrl.u32 %v6902_v38, 16  ;;  %v3077_v11 = vshll.u32 %v6902_v38, 16  ;;  %v5560_v12 = vld [vmem:[%s7502_s2 + $0x228] sm:$0xff]  }
 0x167   : > { %v4238_v57 = vpack.c.bf16 %v1025_v23, %v1024_v61  ;;  %v1169_v16 = vsel %vm6285_vm15, %v1025_v23, 0.0  ;;  %v990_v52 = vadd.f32 %v6988_v2, %v965_v0  ;;  %v966_v9 = vmul.f32 %v6976_v43, %v902_v49  ;;  %v4534_v22 = vpop.f32.mrb[11].mxu0  ;;  %4723 = vmatprep.subr.bf16.mxu0 %v5729_v56  ;;  %v5559_v23 = vld [vmem:[%s7502_s2 + $0xe8] sm:$0xff]   ;;  %4984 = vmatpush3.bf16.msra.mxu1 %v5558_v8 }
 0x168   : > { %v1186_v62 = vadd.f32 %v1185_v6, %v1169_v16  ;;  %v1738_v61 = vrot.slane %v6688_v4, 1  ;;  %4985 = vmatprep.subr.bf16.mxu1 %v5729_v56  ;;  %v3072_v16 = vsel %vm7517_vm0, %v7039_v53, %v7076_v60  ;;  %v5562_v53 = vld [vmem:[%s7502_s2 + $0x230] sm:$0xff]  }
 0x169   : > { %4320 = vst [vmem:[%s6370_s13 + $0x8] sm:$0xff] %v4238_v57   ;;  %v1008_v58 = vmul.f32 0.2, %v990_v52  ;;  %v991_v1 = vadd.f32 %v6988_v2, %v966_v9  ;;  %4688 = vmatmul.mubr.bf16.gmra.mrb[44].mxu0 %v1737_v7  ;;  %v3079_v9 = vrot.slane %v3077_v11, 3 }
 0x16a   : > { %4691 = vmatprep.mubr.msk.bf16.mxu0 %vm7519_vm12, %v5729_v56  ;;  %4724 = vmatpush3.bf16.msra.mxu0 %v5557_v27  ;;  %v1739_v15 = vsel %vm7521_vm2, %v1736_v63, %v1738_v61 }
 0x16b   : > { %v1026_v13 = vmax.f32 %v990_v52, %v1008_v58  ;;  %v1009_v17 = vmul.f32 0.2, %v991_v1  ;;  %4725 = vmatprep.subr.bf16.mxu0 %v5729_v56  ;;  %v3076_v52 = vrot.slane %v3074_v55, 2  ;;  %4986 = vmatpush3.bf16.msra.mxu1 %v5560_v12 }
 0x16c   : > { %v907_v0 = vpop.f32.mrb[12].mxu0  ;;  %4987 = vmatprep.subr.bf16.mxu1 %v5729_v56  ;;  %4952 = vmatmul.mubr.bf16.gmra.mrb[12].mxu1 %v3072_v16 }
 0x16d   : > { %v1170_v7 = vsel %vm6289_vm13, %v1026_v13, 0.0  ;;  %v1027_v6 = vmax.f32 %v991_v1, %v1009_v17  ;;  %v967_v49 = vmul.f32 %v6976_v43, %v907_v0  ;;  %v4537_v50 = vpop.f32.mrb[13].mxu0  ;;  %v3080_v17 = vor.u32 %v3079_v9, %v3076_v52  ;;  %4955 = vmatprep.mubr.msk.bf16.mxu1 %vm7519_vm12, %v5729_v56 }
 0x16e   : > { %v1187_v20 = vadd.f32 %v1186_v62, %v1170_v7  ;;  %v910_v57 = vpop.f32.mrb[14].mxu0  ;;  %4726 = vmatpush3.bf16.msra.mxu0 %v5559_v23  ;;  %v5561_v62 = vld [vmem:[%s7502_s2 + $0xf0] sm:$0xff]   ;;  %v3083_v23 = vshrl.u32 %v6928_v26, 16  ;;  %v3086_v0 = vshll.u32 %v6928_v26, 16 }
 0x16f   : > { %v4243_v22 = vpack.c.bf16 %v1027_v6, %v1026_v13  ;;  %v1171_v27 = vsel %vm6293_vm6, %v1027_v6, 0.0  ;;  %v992_v8 = vadd.f32 %v6988_v2, %v967_v49  ;;  %v968_v58 = vmul.f32 %v6976_v43, %v910_v57  ;;  %v4538_v63 = vpop.f32.mrb[15].mxu0  ;;  %4727 = vmatprep.subr.bf16.mxu0 %v5729_v56  ;;  %4988 = vmatpush3.bf16.msra.mxu1 %v5562_v53  ;;  %v5565_v49 = vld [vmem:[%s7502_s2 + $0x238] sm:$0xff]  }
 0x170   : > { %v1188_v1 = vadd.f32 %v1187_v20, %v1171_v27  ;;  %v1740_v13 = vrot.slane %v6712_v28, 1  ;;  %v5563_v28 = vld [vmem:[%s7502_s2 + $0xf8] sm:$0xff]   ;;  %4989 = vmatprep.subr.bf16.mxu1 %v5729_v56  ;;  %v3085_v27 = vrot.slane %v3083_v23, 2  ;;  %v3092_v23 = vshrl.u32 %v6940_v3, 16 }
 0x171   : > { %4321 = vst [vmem:[%s6370_s13 + $0x10] sm:$0xff] %v4243_v22   ;;  %v1010_v55 = vmul.f32 0.2, %v992_v8  ;;  %v993_v11 = vadd.f32 %v6988_v2, %v968_v58  ;;  %4692 = vmatmul.mubr.bf16.gmra.mrb[48].mxu0 %v1739_v15  ;;  %v3081_v22 = vsel %vm7517_vm0, %v7076_v60, %v3080_v17  ;;  %v1742_v60 = vrot.slane %v6743_v45, 1 }
 0x172   : > { %4695 = vmatprep.mubr.msk.bf16.mxu0 %vm7519_vm12, %v5729_v56  ;;  %4728 = vmatpush3.bf16.msra.mxu0 %v5561_v62  ;;  %v1741_v16 = vsel %vm7521_vm2, %v1738_v61, %v1740_v13  ;;  %vm7631_vm0 = vnez %v7606_v25 }
 0x173   : > { %v1028_v12 = vmax.f32 %v992_v8, %v1010_v55  ;;  %v1011_v7 = vmul.f32 0.2, %v993_v11  ;;  %4729 = vmatprep.subr.bf16.mxu0 %v5729_v56  ;;  %v3088_v8 = vrot.slane %v3086_v0, 3  ;;  %4990 = vmatpush3.bf16.msra.mxu1 %v5565_v49  ;;  %v3095_v0 = vshll.u32 %v6940_v3, 16 }
 0x174   : > { %v915_v6 = vpop.f32.mrb[16].mxu0  ;;  %4956 = vmatmul.mubr.bf16.gmra.mrb[16].mxu1 %v3081_v22 }
 0x175   : > { %v1172_v50 = vsel %vm6308_vm7, %v1028_v12, 0.0  ;;  %v1029_v15 = vmax.f32 %v993_v11, %v1011_v7  ;;  %v969_v20 = vmul.f32 %v6976_v43, %v915_v6  ;;  %v4541_v57 = vpop.f32.mrb[17].mxu0  ;;  %v3089_v11 = vor.u32 %v3088_v8, %v3085_v27  ;;  %4959 = vmatprep.mubr.msk.bf16.mxu1 %vm7519_vm12, %v5729_v56 }
 0x176   : > { %v1189_v52 = vadd.f32 %v1188_v1, %v1172_v50  ;;  %v918_v9 = vpop.f32.mrb[18].mxu0  ;;  %4730 = vmatpush3.bf16.msra.mxu0 %v5563_v28  ;;  %vm7638_vm7 = vnez %v7614_v44 }
 0x177   : > { %v4248_v58 = vpack.c.bf16 %v1029_v15, %v1028_v12  ;;  %v1173_v63 = vsel %vm6312_vm8, %v1029_v15, 0.0  ;;  %v994_v62 = vadd.f32 %v6988_v2, %v969_v20  ;;  %v970_v4 = vmul.f32 %v6976_v43, %v918_v9  ;;  %v4542_v53 = vpop.f32.mrb[19].mxu0 }
 0x178   : > { %v1190_v61 = vadd.f32 %v1189_v52, %v1173_v63  ;;  %v1743_v15 = vsel %vm7521_vm2, %v1740_v13, %v1742_v60  ;;  %vm7632_vm8 = vsmask.f32 5376  ;;  %v3094_v52 = vrot.slane %v3092_v23, 2 }
 0x179   : > { %4322 = vst [vmem:[%s6370_s13 + $0x18] sm:$0xff] %v4248_v58   ;;  %v1012_v1 = vmul.f32 0.2, %v994_v62  ;;  %v995_v55 = vadd.f32 %v6988_v2, %v970_v4  ;;  %4696 = vmatmul.mubr.bf16.gmra.mrb[52].mxu0 %v1741_v16  ;;  %v3090_v16 = vsel %vm7632_vm8, %v3080_v17, %v3089_v11  ;;  %v3097_v9 = vrot.slane %v3095_v0, 3 }
 0x17a   : > { %4699 = vmatprep.mubr.msk.bf16.mxu0 %vm7519_vm12, %v5729_v56  ;;  %vm7633_vm12 = vnez %v7610_v37  ;;  %v1744_v53 = vrot.slane %v6768_v14, 1  ;;  %vm7634_vm8 = vmmov 0   ;;  %vm7635_vm2 = vnez %v7612_v41 }
 0x17b   : > { %v1030_v12 = vmax.f32 %v994_v62, %v1012_v1  ;;  %v1013_v7 = vmul.f32 0.2, %v995_v55  ;;  %v3098_v17 = vor.u32 %v3097_v9, %v3094_v52  ;;  %v3104_v1 = vshll.u32 %v6950_v19, 16 }
 0x17c   : > { %v923_v28 = vpop.f32.mrb[20].mxu0  ;;  %4960 = vmatmul.mubr.bf16.gmra.mrb[20].mxu1 %v3090_v16 }
 0x17d   : > { %v1174_v6 = vsel %vm7631_vm0, %v1030_v12, 0.0  ;;  %v1031_v45 = vmax.f32 %v995_v55, %v1013_v7  ;;  %v971_v49 = vmul.f32 %v6976_v43, %v923_v28  ;;  %v4545_v50 = vpop.f32.mrb[21].mxu0  ;;  %4963 = vmatprep.mubr.msk.bf16.mxu1 %vm7634_vm8, %v5729_v56  ;;  %vm7637_vm0 = vsmask.f32 5376 }
 0x17e   : > { %v1191_v20 = vadd.f32 %v1190_v61, %v1174_v6  ;;  %v926_v57 = vpop.f32.mrb[22].mxu0  ;;  %v3101_v61 = vshrl.u32 %v6950_v19, 16  ;;  %v3099_v50 = vsel %vm7637_vm0, %v3089_v11, %v3098_v17  ;;  %v1746_v11 = vrot.slane %v6780_v48, 1 }
 0x17f   : > { %v4253_v22 = vpack.c.bf16 %v1031_v45, %v1030_v12  ;;  %v1175_v27 = vsel %vm7633_vm12, %v1031_v45, 0.0  ;;  %v996_v8 = vadd.f32 %v6988_v2, %v971_v49  ;;  %v972_v58 = vmul.f32 %v6976_v43, %v926_v57  ;;  %v4546_v63 = vpop.f32.mrb[23].mxu0  ;;  %v7173_v57 = vld [vmem:[%s5926_s11 + $0x58] ss:$0 sps:$4 sm:$0x77]  }
 0x180   : > { %v1192_v62 = vadd.f32 %v1191_v20, %v1175_v27  ;;  %vm7636_vm12 = vcmask 1046528   ;;  %v3106_v20 = vrot.slane %v3104_v1, 3 }
 0x181   : > { %4323 = vst [vmem:[%s6370_s13 + $0x20] sm:$0xff] %v4253_v22   ;;  %v1014_v4 = vmul.f32 0.2, %v996_v8  ;;  %v997_v13 = vadd.f32 %v6988_v2, %v972_v58  ;;  %4700 = vmatmul.mubr.bf16.gmra.mrb[56].mxu0 %v1743_v15  ;;  %v1745_v6 = vsel %vm7636_vm12, %v1742_v60, %v1744_v53  ;;  %v3103_v15 = vrot.slane %v3101_v61, 2 }
 0x182   : > { %4703 = vmatprep.mubr.msk.bf16.mxu0 %vm7634_vm8, %v5729_v56 }
 0x183   : > { %v1032_v55 = vmax.f32 %v996_v8, %v1014_v4  ;;  %v1015_v23 = vmul.f32 0.2, %v997_v13  ;;  %v3107_v63 = vor.u32 %v3106_v20, %v3103_v15  ;;  %v3113_v4 = vshll.u32 %v7173_v57, 16 }
 0x184   : > { %v931_v0 = vpop.f32.mrb[24].mxu0  ;;  %4964 = vmatmul.mubr.bf16.gmra.mrb[24].mxu1 %v3099_v50 }
 0x185   : > { %v1176_v12 = vsel %vm7635_vm2, %v1032_v55, 0.0  ;;  %v1033_v14 = vmax.f32 %v997_v13, %v1015_v23  ;;  %v973_v7 = vmul.f32 %v6976_v43, %v931_v0  ;;  %v4549_v28 = vpop.f32.mrb[25].mxu0  ;;  %4967 = vmatprep.mubr.msk.bf16.mxu1 %vm7634_vm8, %v5729_v56 }
 0x186   : > { %v1193_v45 = vadd.f32 %v1192_v62, %v1176_v12  ;;  %v934_v49 = vpop.f32.mrb[26].mxu0  ;;  %v3110_v62 = vshrl.u32 %v7173_v57, 16  ;;  %v1747_v12 = vsel %vm7636_vm12, %v1744_v53, %v1746_v11  ;;  %v3108_v28 = vsel %vm7637_vm0, %v3098_v17, %v3107_v63 }
 0x187   : > { %v4258_v16 = vpack.c.bf16 %v1033_v14, %v1032_v55  ;;  %v1177_v52 = vsel %vm7638_vm7, %v1033_v14, 0.0  ;;  %v998_v9 = vadd.f32 %v6988_v2, %v973_v7  ;;  %v974_v22 = vmul.f32 %v6976_v43, %v934_v49  ;;  %v4550_v27 = vpop.f32.mrb[27].mxu0 }
 0x188   : > { %v1194_v8 = vadd.f32 %v1193_v45, %v1177_v52  ;;  %v3115_v45 = vrot.slane %v3113_v4, 3  ;;  %v1748_v17 = vrot.slane %v6792_v29, 1 }
 0x189   : > { %4324 = vst [vmem:[%s6370_s13 + $0x28] sm:$0xff] %v4258_v16   ;;  %v1016_v60 = vmul.f32 0.2, %v998_v9  ;;  %v999_v58 = vadd.f32 %v6988_v2, %v974_v22  ;;  %4704 = vmatmul.mubr.bf16.gmra.mrb[60].mxu0 %v1745_v6  ;;  %v3112_v6 = vrot.slane %v3110_v62, 2 }
 0x18a   : > { %4707 = vmatprep.mubr.msk.bf16.mxu0 %vm7634_vm8, %v5729_v56  ;;  %v1749_v29 = vsel %vm7636_vm12, %v1746_v11, %v1748_v17  ;;  %v5568_v11 = vld [vmem:[%s5926_s11 + $0x10] sm:$0xff]   ;;  %vm3319_vm12 = vcmask 1044480  }
 0x18b   : > { %v1034_v13 = vmax.f32 %v998_v9, %v1016_v60  ;;  %v1017_v61 = vmul.f32 0.2, %v999_v58  ;;  %v3116_v22 = vor.u32 %v3115_v45, %v3112_v6  ;;  %v3298_v60 = vld [vmem:[%s5926_s11 + $0x10] sm:$0x8] }
 0x18c   : > { %v939_v1 = vpop.f32.mrb[28].mxu0  ;;  %4968 = vmatmul.mubr.bf16.gmra.mrb[28].mxu1 %v3108_v28 }
 0x18d   : > { %v1178_v55 = vsel %vm6344_vm5, %v1034_v13, 0.0  ;;  %v1035_v48 = vmax.f32 %v999_v58, %v1017_v61  ;;  %v975_v23 = vmul.f32 %v6976_v43, %v939_v1  ;;  %v4553_v0 = vpop.f32.mrb[29].mxu0  ;;  %4971 = vmatprep.mubr.msk.bf16.mxu1 %vm7634_vm8, %v5729_v56 }
 0x18e   : > { %v1195_v14 = vadd.f32 %v1194_v8, %v1178_v55  ;;  %v942_v7 = vpop.f32.mrb[30].mxu0 }
 0x18f   : > { %v4263_v49 = vpack.c.bf16 %v1035_v48, %v1034_v13  ;;  %v1179_v50 = vsel %vm6348_vm14, %v1035_v48, 0.0  ;;  %v1000_v15 = vadd.f32 %v6988_v2, %v975_v23  ;;  %v976_v20 = vmul.f32 %v6976_v43, %v942_v7  ;;  %v4554_v16 = vpop.f32.mrb[31].mxu0 }
 0x190   : > { %v1196_v52 = vadd.f32 %v1195_v14, %v1179_v50  ;;  %v3117_v48 = vsel %vm7637_vm0, %v3107_v63, %v3116_v22  ;;  %v4159_v23 = vcombine.low %v3298_v60, %v6808_v59  ;;  %v2014_v59 = vrot.slane %v6437_v21, 1 }
 0x191   : > { %4325 = vst [vmem:[%s6370_s13 + $0x30] sm:$0xff] %v4263_v49   ;;  %v1018_v9 = vmul.f32 0.2, %v1000_v15  ;;  %v1001_v53 = vadd.f32 %v6988_v2, %v976_v20  ;;  %4708 = vmatmul.mubr.bf16.gmra.mrb[64].mxu0 %v1747_v12  ;;  %v2015_v63 = vrot.slane %v5568_v11, 1  ;;  %v3321_v20 = vrot.slane %v6816_v39, 3  ;;  %v5569_v39 = vld [vmem:[%s5926_s11 + $0x18] sm:$0xff]  }
 0x192   : > { %4711 = vmatprep.mubr.msk.bf16.mxu0 %vm7634_vm8, %v5729_v56  ;;  %vm7639_vm0 = vcmask 1046528   ;;  %v3333_v11 = vrot.slane %v6940_v3, 3 }
 0x193   : > { %v1036_v27 = vmax.f32 %v1000_v15, %v1018_v9  ;;  %v1019_v8 = vmul.f32 0.2, %v1001_v53  ;;  %v2016_v21 = vsel %vm7639_vm0, %v2014_v59, %v2015_v63 }
 0x194   : > { %v947_v58 = vpop.f32.mrb[32].mxu0  ;;  %4972 = vmatmul.mubr.bf16.gmra.mrb[32].mxu1 %v3117_v48 }
 0x195   : > { %v1180_v62 = vsel %vm6352_vm1, %v1036_v27, 0.0  ;;  %v1037_v4 = vmax.f32 %v1001_v53, %v1019_v8  ;;  %v977_v13 = vmul.f32 %v6976_v43, %v947_v58  ;;  %v4557_v61 = vpop.f32.mrb[33].mxu0  ;;  %4991 = vmatprep.mubr.msk.bf16.mxu1 %vm7634_vm8, %v5729_v56  ;;  %v3323_v8 = vrot.slane %v6832_v5, 3 }
 0x196   : > { %v1197_v1 = vadd.f32 %v1196_v52, %v1180_v62  ;;  %v950_v55 = vpop.f32.mrb[34].mxu0  ;;  %v5570_v62 = vld [vmem:[%s5926_s11 + $0x20] sm:$0xff]  }
 0x197   : > { %v4268_v0 = vpack.c.bf16 %v1037_v4, %v1036_v27  ;;  %v1181_v12 = vsel %vm6357_vm3, %v1037_v4, 0.0  ;;  %v1002_v14 = vadd.f32 %v6988_v2, %v977_v13  ;;  %v978_v7 = vmul.f32 %v6976_v43, %v950_v55  ;;  %v4558_v28 = vpop.f32.mrb[35].mxu0 }
 0x198   : > { %v1198_v6 = vadd.f32 %v1197_v1, %v1181_v12  ;;  %v3320_v43 = vrot.slane %v4159_v23, 3  ;;  %vm7640_vm3 = vnez %v7628_v54  ;;  %v2017_v27 = vrot.slane %v5569_v39, 1  ;;  %v5571_v1 = vld [vmem:[%s5926_s11 + $0x28] sm:$0xff]   ;;  %v5572_v23 = vld [vmem:[%s5926_s11 + $0x30] sm:$0xff]  }
 0x199   : > { %4326 = vst [vmem:[%s6370_s13 + $0x38] sm:$0xff] %v4268_v0   ;;  %v1020_v45 = vmul.f32 0.2, %v1002_v14  ;;  %v1003_v49 = vadd.f32 %v6988_v2, %v978_v7  ;;  %4712 = vmatmul.mubr.bf16.gmra.mrb[68].mxu0 %v1749_v29  ;;  %v3324_v58 = vsel %vm3319_vm12, %v3321_v20, %v3323_v8  ;;  %v2019_v4 = vrot.slane %v5570_v62, 1  ;;  %v5573_v7 = vld [vmem:[%s5926_s11 + $0x38] sm:$0xff]  }
 0x19a   : > { %4731 = vmatprep.mubr.msk.bf16.mxu0 %vm7634_vm8, %v5729_v56  ;;  %v3322_v17 = vsel %vm3319_vm12, %v3320_v43, %v3321_v20  ;;  %v2018_v60 = vsel %vm7639_vm0, %v2015_v63, %v2017_v27  ;;  %v3325_v13 = vrot.slane %v6850_v24, 3  ;;  %v2021_v55 = vrot.slane %v5571_v1, 1 }
 0x19b   : > { %v1038_v50 = vmax.f32 %v1002_v14, %v1020_v45  ;;  %v1021_v15 = vmul.f32 0.2, %v1003_v49  ;;  %v3327_v29 = vrot.slane %v6876_v18, 3  ;;  %v2023_v0 = vrot.slane %v5572_v23, 1 }
 0x19c   : > { %4992 = vmatmul.mubr.bf16.vlgmr.msra.gmra.mrb[0].mxu1 %v3322_v17  ;;  %v3326_v5 = vsel %vm3319_vm12, %v3323_v8, %v3325_v13  ;;  %v2022_v48 = vsel %vm7639_vm0, %v2019_v4, %v2021_v55  ;;  %v3329_v12 = vrot.slane %v6902_v38, 3  ;;  %v2025_v28 = vrot.slane %v5573_v7, 1  ;;  %v7300_v17 = vld [vmem:[%s7503_s3 + $0x1] ss:$0 sm:$0xff] }
 0x19d   : > { %v1182_v2 = vsel %vm6361_vm10, %v1038_v50, 0.0  ;;  %v1039_v16 = vmax.f32 %v1003_v49, %v1021_v15  ;;  %4995 = vmatprep.mubr.msk.bf16.mxu1 %vm7634_vm8, %v5729_v56  ;;  %v3328_v24 = vsel %vm3319_vm12, %v3325_v13, %v3327_v29  ;;  %v5574_v49 = vld [vmem:[%s5926_s11 + $0x40] sm:$0xff]   ;;  %v3335_v43 = vrot.slane %v6950_v19, 3 }
 0x19e   : > { %v1199_v52 = vadd.f32 %v1198_v6, %v1182_v2  ;;  %v3330_v18 = vsel %vm3319_vm12, %v3327_v29, %v3329_v12  ;;  %v3331_v6 = vrot.slane %v6928_v26, 3  ;;  %v2026_v45 = vsel %vm7639_vm0, %v2023_v0, %v2025_v28  ;;  %v5567_v2 = vld [vmem:[%s5926_s11 + $0x50] ss:$0 sps:$4 sm:$0x11]  }
 0x19f   : > { %v4273_v9 = vpack.c.bf16 %v1039_v16, %v1038_v50  ;;  %v1183_v53 = vsel %vm7640_vm3, %v1039_v16, 0.0  ;;  %vm7641_vm3 = vmmov %vm7639_vm0  ;;  %v2027_v59 = vrot.slane %v5574_v49, 1  ;;  %v5575_v50 = vld [vmem:[%s5926_s11 + $0x48] sm:$0xff]   ;;  %v3336_v3 = vsel %vm3319_vm12, %v3333_v11, %v3335_v43 }
 0x1a0   : > { %v7230_v22 = vadd.f32 %v1199_v52, %v1183_v53  ;;  %v2020_v61 = vsel %vm7641_vm3, %v2017_v27, %v2019_v4  ;;  %vm7642_vm3 = vmmov %vm7639_vm0  ;;  %v3332_v38 = vsel %vm3319_vm12, %v3329_v12, %v3331_v6  ;;  %v3334_v26 = vsel %vm3319_vm12, %v3331_v6, %v3333_v11 }
 0x1a1   : > { %4327 = vst [vmem:[%s6370_s13 + $0x40] sm:$0xff] %v4273_v9   ;;  %4732 = vmatmul.mubr.bf16.vlgmr.msra.gmra.mrb[36].mxu0 %v2016_v21  ;;  %v2024_v14 = vsel %vm7642_vm3, %v2021_v55, %v2023_v0  ;;  %vm7643_vm3 = vmmov %vm7639_vm0  ;;  %v2029_v15 = vrot.slane %v5575_v50, 1  ;;  %v2031_v16 = vrot.slane %v5567_v2, 1  ;;  %v3337_v52 = vrot.slane %v7173_v57, 3 }
 0x1a2   : > { %4735 = vmatprep.mubr.msk.bf16.mxu0 %vm7634_vm8, %v5729_v56  ;;  %v2028_v63 = vsel %vm7643_vm3, %v2025_v28, %v2027_v59  ;;  %vm7644_vm3 = vmmov %vm7639_vm0 }
 0x1a3   : > { %v2030_v20 = vsel %vm7639_vm0, %v2027_v59, %v2029_v15  ;;  %v2032_v21 = vsel %vm7644_vm3, %v2029_v15, %v2031_v16  ;;  %v3338_v19 = vsel %vm3319_vm12, %v3335_v43, %v3337_v52 }
 0x1a4   : > { %4996 = vmatmul.mubr.bf16.gmra.mrb[4].mxu1 %v3324_v58 }
 0x1a5   : > { %4999 = vmatprep.mubr.msk.bf16.mxu1 %vm7634_vm8, %v5729_v56 }
 0x1a9   : > { %4736 = vmatmul.mubr.bf16.gmra.mrb[40].mxu0 %v2018_v60 }
 0x1aa   : > { %4739 = vmatprep.mubr.msk.bf16.mxu0 %vm7634_vm8, %v5729_v56 }
 0x1ac   : > { %5000 = vmatmul.mubr.bf16.gmra.mrb[8].mxu1 %v3326_v5 }
 0x1ad   : > { %5003 = vmatprep.mubr.msk.bf16.mxu1 %vm7634_vm8, %v5729_v56 }
 0x1b1   : > { %4740 = vmatmul.mubr.bf16.gmra.mrb[44].mxu0 %v2020_v61 }
 0x1b2   : > { %4743 = vmatprep.mubr.msk.bf16.mxu0 %vm7634_vm8, %v5729_v56 }
 0x1b4   : > { %5004 = vmatmul.mubr.bf16.gmra.mrb[12].mxu1 %v3328_v24 }
 0x1b5   : > { %5007 = vmatprep.mubr.msk.bf16.mxu1 %vm7634_vm8, %v5729_v56 }
 0x1b9   : > { %4744 = vmatmul.mubr.bf16.gmra.mrb[48].mxu0 %v2022_v48 }
 0x1ba   : > { %4747 = vmatprep.mubr.msk.bf16.mxu0 %vm7634_vm8, %v5729_v56 }
 0x1bc   : > { %5008 = vmatmul.mubr.bf16.gmra.mrb[16].mxu1 %v3330_v18 }
 0x1bd   : > { %5011 = vmatprep.mubr.msk.bf16.mxu1 %vm7634_vm8, %v5729_v56 }
 0x1c1   : > { %4748 = vmatmul.mubr.bf16.gmra.mrb[52].mxu0 %v2024_v14 }
 0x1c2   : > { %4751 = vmatprep.mubr.msk.bf16.mxu0 %vm7634_vm8, %v5729_v56 }
 0x1c4   : > { %5012 = vmatmul.mubr.bf16.gmra.mrb[20].mxu1 %v3332_v38 }
 0x1c5   : > { %5015 = vmatprep.mubr.msk.bf16.mxu1 %vm7634_vm8, %v5729_v56 }
 0x1c9   : > { %4752 = vmatmul.mubr.bf16.gmra.mrb[56].mxu0 %v2026_v45 }
 0x1ca   : > { %4755 = vmatprep.mubr.msk.bf16.mxu0 %vm7634_vm8, %v5729_v56 }
 0x1cc   : > { %5016 = vmatmul.mubr.bf16.gmra.mrb[24].mxu1 %v3334_v26 }
 0x1cd   : > { %5019 = vmatprep.mubr.msk.bf16.mxu1 %vm7634_vm8, %v5729_v56 }
 0x1d1   : > { %4756 = vmatmul.mubr.bf16.gmra.mrb[60].mxu0 %v2028_v63 }
 0x1d2   : > { %4759 = vmatprep.mubr.msk.bf16.mxu0 %vm7634_vm8, %v5729_v56 }
 0x1d4   : > { %5020 = vmatmul.mubr.bf16.gmra.mrb[28].mxu1 %v3336_v3 }
 0x1d5   : > { %5023 = vmatprep.mubr.msk.bf16.mxu1 %vm7634_vm8, %v5729_v56 }
 0x1d9   : > { %4760 = vmatmul.mubr.bf16.gmra.mrb[64].mxu0 %v2030_v20 }
 0x1da   : > { %4763 = vmatprep.mubr.msk.bf16.mxu0 %vm7634_vm8, %v5729_v56  ;;  %v7305_v56 = vld [vmem:[%s7504_s4 + $0x1] ss:$0 sm:$0xff] }
 0x1dc   : > { %5024 = vmatmul.mubr.bf16.gmra.mrb[32].mxu1 %v3338_v19 }
 0x1e1   : > { %4764 = vmatmul.mubr.bf16.gmra.mrb[68].mxu0 %v2032_v21 }
 0x26f   : > { %v3430_v53 = vpop.f32.mrb[0].mxu1 }
 0x270   : > { %v4993_v8 = vpop.f32.mrb[1].mxu1 }
 0x271   : > { %v3433_v57 = vpop.f32.mrb[2].mxu1 }
 0x272   : > { %v4994_v13 = vpop.f32.mrb[3].mxu1 }
 0x274   : > { %v2124_v9 = vpop.f32.mrb[36].mxu0 }
 0x275   : > { %v4733_v39 = vpop.f32.mrb[37].mxu0  ;;  %v5027_v27 = vadd.f32 %v3430_v53, %v2124_v9 }
 0x276   : > { %v2127_v60 = vpop.f32.mrb[38].mxu0 }
 0x277   : > { %v4734_v58 = vpop.f32.mrb[39].mxu0  ;;  %v3527_v62 = vmul.f32 %v5027_v27, %v7300_v17  ;;  %v5028_v4 = vadd.f32 %v3433_v57, %v2127_v60  ;;  %v3438_v48 = vpop.f32.mrb[4].mxu1 }
 0x278   : > { %v4997_v14 = vpop.f32.mrb[5].mxu1 }
 0x279   : > { %v3553_v61 = vadd.f32 %v7305_v56, %v3527_v62  ;;  %v3528_v5 = vmul.f32 %v5028_v4, %v7300_v17  ;;  %v3441_v7 = vpop.f32.mrb[6].mxu1 }
 0x27a   : > { %v4998_v49 = vpop.f32.mrb[7].mxu1 }
 0x27b   : > { %v3571_v1 = vmul.f32 0.2, %v3553_v61  ;;  %v3554_v55 = vadd.f32 %v7305_v56, %v3528_v5 }
 0x27c   : > { %v2132_v29 = vpop.f32.mrb[40].mxu0 }
 0x27d   : > { %v4737_v24 = vpop.f32.mrb[41].mxu0  ;;  %v3589_v23 = vmax.f32 %v3553_v61, %v3571_v1  ;;  %v3572_v0 = vmul.f32 0.2, %v3554_v55  ;;  %v5029_v12 = vadd.f32 %v3438_v48, %v2132_v29 }
 0x27e   : > { %v2135_v18 = vpop.f32.mrb[42].mxu0 }
 0x27f   : > { %v4738_v28 = vpop.f32.mrb[43].mxu0  ;;  %v3590_v6 = vmax.f32 %v3554_v55, %v3572_v0  ;;  %v3529_v45 = vmul.f32 %v5029_v12, %v7300_v17  ;;  %v5030_v38 = vadd.f32 %v3441_v7, %v2135_v18  ;;  %v3697_v59 = vsel %vm6262_vm11, %v3589_v23, 0.0  ;;  %v3446_v3 = vpop.f32.mrb[8].mxu1 }
 0x280   : > { %v5001_v19 = vpop.f32.mrb[9].mxu1  ;;  %vm7645_vm11 = vnez %v7602_v40 }
 0x281   : > { %v4278_v11 = vpack.c.bf16 %v3590_v6, %v3589_v23  ;;  %v3698_v63 = vsel %vm6266_vm4, %v3590_v6, 0.0  ;;  %v3555_v26 = vadd.f32 %v7305_v56, %v3529_v45  ;;  %v3530_v50 = vmul.f32 %v5030_v38, %v7300_v17  ;;  %v3449_v31 = vpop.f32.mrb[10].mxu1 }
 0x282   : > { %v3715_v15 = vadd.f32 %v3698_v63, %v3697_v59  ;;  %v5002_v57 = vpop.f32.mrb[11].mxu1  ;;  %vm7646_vm4 = vnez %v7604_v10 }
 0x283   : > { %4328 = vst [vmem:[%s6370_s13 + $0x48] sm:$0xff] %v4278_v11   ;;  %v3573_v43 = vmul.f32 0.2, %v3555_v26  ;;  %v3556_v20 = vadd.f32 %v7305_v56, %v3530_v50 }
 0x284   : > { %v2140_v2 = vpop.f32.mrb[44].mxu0 }
 0x285   : > { %v4741_v16 = vpop.f32.mrb[45].mxu0  ;;  %v3591_v52 = vmax.f32 %v3555_v26, %v3573_v43  ;;  %v3574_v21 = vmul.f32 0.2, %v3556_v20  ;;  %v5031_v30 = vadd.f32 %v3446_v3, %v2140_v2 }
 0x286   : > { %v2143_v9 = vpop.f32.mrb[46].mxu0 }
 0x287   : > { %v4742_v53 = vpop.f32.mrb[47].mxu0  ;;  %v3699_v39 = vsel %vm6270_vm9, %v3591_v52, 0.0  ;;  %v3592_v27 = vmax.f32 %v3556_v20, %v3574_v21  ;;  %v3531_v8 = vmul.f32 %v5031_v30, %v7300_v17  ;;  %v5032_v60 = vadd.f32 %v3449_v31, %v2143_v9  ;;  %v3454_v29 = vpop.f32.mrb[12].mxu1 }
 0x288   : > { %v3716_v58 = vadd.f32 %v3715_v15, %v3699_v39  ;;  %v5005_v12 = vpop.f32.mrb[13].mxu1  ;;  %vm7647_vm9 = vnez %v7606_v25 }
 0x289   : > { %v4283_v62 = vpack.c.bf16 %v3592_v27, %v3591_v52  ;;  %v3700_v4 = vsel %vm6285_vm15, %v3592_v27, 0.0  ;;  %v3557_v13 = vadd.f32 %v7305_v56, %v3531_v8  ;;  %v3532_v61 = vmul.f32 %v5032_v60, %v7300_v17  ;;  %v3457_v34 = vpop.f32.mrb[14].mxu1 }
 0x28a   : > { %v3717_v5 = vadd.f32 %v3716_v58, %v3700_v4  ;;  %v5006_v38 = vpop.f32.mrb[15].mxu1  ;;  %vm7648_vm15 = vnez %v7610_v37 }
 0x28b   : > { %4329 = vst [vmem:[%s6370_s13 + $0x50] sm:$0xff] %v4283_v62   ;;  %v3575_v1 = vmul.f32 0.2, %v3557_v13  ;;  %v3558_v32 = vadd.f32 %v7305_v56, %v3532_v61 }
 0x28c   : > { %v2148_v55 = vpop.f32.mrb[48].mxu0 }
 0x28d   : > { %v4745_v48 = vpop.f32.mrb[49].mxu0  ;;  %v3593_v24 = vmax.f32 %v3557_v13, %v3575_v1  ;;  %v3576_v23 = vmul.f32 0.2, %v3558_v32  ;;  %v5033_v0 = vadd.f32 %v3454_v29, %v2148_v55 }
 0x28e   : > { %v2151_v14 = vpop.f32.mrb[50].mxu0 }
 0x28f   : > { %v4746_v18 = vpop.f32.mrb[51].mxu0  ;;  %v3701_v7 = vsel %vm6289_vm13, %v3593_v24, 0.0  ;;  %v3594_v28 = vmax.f32 %v3558_v32, %v3576_v23  ;;  %v3533_v6 = vmul.f32 %v5033_v0, %v7300_v17  ;;  %v5034_v45 = vadd.f32 %v3457_v34, %v2151_v14  ;;  %v3462_v20 = vpop.f32.mrb[16].mxu1 }
 0x290   : > { %v3718_v49 = vadd.f32 %v3717_v5, %v3701_v7  ;;  %v5009_v21 = vpop.f32.mrb[17].mxu1  ;;  %vm7649_vm13 = vnez %v7624_v47 }
 0x291   : > { %v4288_v59 = vpack.c.bf16 %v3594_v28, %v3593_v24  ;;  %v3702_v11 = vsel %vm6293_vm6, %v3594_v28, 0.0  ;;  %v3559_v63 = vadd.f32 %v7305_v56, %v3533_v6  ;;  %v3534_v26 = vmul.f32 %v5034_v45, %v7300_v17  ;;  %v3465_v36 = vpop.f32.mrb[18].mxu1 }
 0x292   : > { %v3719_v50 = vadd.f32 %v3718_v49, %v3702_v11  ;;  %v5010_v27 = vpop.f32.mrb[19].mxu1  ;;  %vm7650_vm6 = vnez %v7628_v54 }
 0x293   : > { %4330 = vst [vmem:[%s6370_s13 + $0x58] sm:$0xff] %v4288_v59   ;;  %v3577_v15 = vmul.f32 0.2, %v3559_v63  ;;  %v3560_v35 = vadd.f32 %v7305_v56, %v3534_v26 }
 0x294   : > { %v2156_v43 = vpop.f32.mrb[52].mxu0 }
 0x295   : > { %v4749_v2 = vpop.f32.mrb[53].mxu0  ;;  %v3595_v3 = vmax.f32 %v3559_v63, %v3577_v15  ;;  %v3578_v16 = vmul.f32 0.2, %v3560_v35  ;;  %v5035_v52 = vadd.f32 %v3462_v20, %v2156_v43 }
 0x296   : > { %v2159_v30 = vpop.f32.mrb[54].mxu0 }
 0x297   : > { %v4750_v19 = vpop.f32.mrb[55].mxu0  ;;  %v3703_v9 = vsel %vm7645_vm11, %v3595_v3, 0.0  ;;  %v3596_v31 = vmax.f32 %v3560_v35, %v3578_v16  ;;  %v3535_v53 = vmul.f32 %v5035_v52, %v7300_v17  ;;  %v5036_v39 = vadd.f32 %v3465_v36, %v2159_v30  ;;  %v3470_v5 = vpop.f32.mrb[20].mxu1 }
 0x298   : > { %v3720_v8 = vadd.f32 %v3719_v50, %v3703_v9  ;;  %v5013_v48 = vpop.f32.mrb[21].mxu1 }
 0x299   : > { %v4293_v60 = vpack.c.bf16 %v3596_v31, %v3595_v3  ;;  %v3704_v57 = vsel %vm7646_vm4, %v3596_v31, 0.0  ;;  %v3561_v58 = vadd.f32 %v7305_v56, %v3535_v53  ;;  %v3536_v62 = vmul.f32 %v5036_v39, %v7300_v17  ;;  %v3473_v10 = vpop.f32.mrb[22].mxu1 }
 0x29a   : > { %v3721_v4 = vadd.f32 %v3720_v8, %v3704_v57  ;;  %v5014_v18 = vpop.f32.mrb[23].mxu1 }
 0x29b   : > { %4331 = vst [vmem:[%s6370_s13 + $0x60] sm:$0xff] %v4293_v60   ;;  %v3579_v13 = vmul.f32 0.2, %v3561_v58  ;;  %v3562_v40 = vadd.f32 %v7305_v56, %v3536_v62 }
 0x29c   : > { %v2164_v61 = vpop.f32.mrb[56].mxu0 }
 0x29d   : > { %v4753_v1 = vpop.f32.mrb[57].mxu0  ;;  %v3597_v32 = vmax.f32 %v3561_v58, %v3579_v13  ;;  %v3580_v55 = vmul.f32 0.2, %v3562_v40  ;;  %v5037_v29 = vadd.f32 %v3470_v5, %v2164_v61 }
 0x29e   : > { %v2167_v24 = vpop.f32.mrb[58].mxu0 }
 0x29f   : > { %v4754_v23 = vpop.f32.mrb[59].mxu0  ;;  %v3705_v0 = vsel %vm7647_vm9, %v3597_v32, 0.0  ;;  %v3598_v12 = vmax.f32 %v3562_v40, %v3580_v55  ;;  %v3537_v14 = vmul.f32 %v5037_v29, %v7300_v17  ;;  %v5038_v34 = vadd.f32 %v3473_v10, %v2167_v24  ;;  %v3478_v63 = vpop.f32.mrb[24].mxu1 }
 0x2a0   : > { %v3722_v7 = vadd.f32 %v3721_v4, %v3705_v0  ;;  %v5017_v43 = vpop.f32.mrb[25].mxu1 }
 0x2a1   : > { %v4298_v28 = vpack.c.bf16 %v3598_v12, %v3597_v32  ;;  %v3706_v6 = vsel %vm7648_vm15, %v3598_v12, 0.0  ;;  %v3563_v45 = vadd.f32 %v7305_v56, %v3537_v14  ;;  %v3538_v38 = vmul.f32 %v5038_v34, %v7300_v17  ;;  %v3481_v37 = vpop.f32.mrb[26].mxu1 }
 0x2a2   : > { %v3723_v49 = vadd.f32 %v3722_v7, %v3706_v6  ;;  %v5018_v30 = vpop.f32.mrb[27].mxu1 }
 0x2a3   : > { %4332 = vst [vmem:[%s6370_s13 + $0x68] sm:$0xff] %v4298_v28   ;;  %v3581_v59 = vmul.f32 0.2, %v3563_v45  ;;  %v3564_v25 = vadd.f32 %v7305_v56, %v3538_v38 }
 0x2a4   : > { %v2172_v11 = vpop.f32.mrb[60].mxu0 }
 0x2a5   : > { %v4757_v26 = vpop.f32.mrb[61].mxu0  ;;  %v3599_v50 = vmax.f32 %v3563_v45, %v3581_v59  ;;  %v3582_v15 = vmul.f32 0.2, %v3564_v25  ;;  %v5039_v35 = vadd.f32 %v3478_v63, %v2172_v11 }
 0x2a6   : > { %v2175_v20 = vpop.f32.mrb[62].mxu0 }
 0x2a7   : > { %v4758_v2 = vpop.f32.mrb[63].mxu0  ;;  %v3707_v3 = vsel %vm7635_vm2, %v3599_v50, 0.0  ;;  %v3600_v16 = vmax.f32 %v3564_v25, %v3582_v15  ;;  %v3539_v52 = vmul.f32 %v5039_v35, %v7300_v17  ;;  %v5040_v21 = vadd.f32 %v3481_v37, %v2175_v20  ;;  %v3486_v60 = vpop.f32.mrb[28].mxu1 }
 0x2a8   : > { %v3724_v36 = vadd.f32 %v3723_v49, %v3707_v3  ;;  %v5021_v13 = vpop.f32.mrb[29].mxu1  ;;  %v1201_v2 = vrot.slane %v7230_v22, 4 }
 0x2a9   : > { %v4303_v19 = vpack.c.bf16 %v3600_v16, %v3599_v50  ;;  %v3708_v9 = vsel %vm7638_vm7, %v3600_v16, 0.0  ;;  %v3565_v31 = vadd.f32 %v7305_v56, %v3539_v52  ;;  %v3540_v53 = vmul.f32 %v5040_v21, %v7300_v17  ;;  %v3489_v44 = vpop.f32.mrb[30].mxu1 }
 0x2aa   : > { %v3725_v39 = vadd.f32 %v3724_v36, %v3708_v9  ;;  %v5022_v29 = vpop.f32.mrb[31].mxu1  ;;  %v1202_v47 = vadd.f32 %v1201_v2, %v7230_v22 }
 0x2ab   : > { %4333 = vst [vmem:[%s6370_s13 + $0x70] sm:$0xff] %v4303_v19   ;;  %v3583_v27 = vmul.f32 0.2, %v3565_v31  ;;  %v3566_v41 = vadd.f32 %v7305_v56, %v3540_v53 }
 0x2ac   : > { %v2180_v8 = vpop.f32.mrb[64].mxu0  ;;  %v1203_v22 = vrot.slane %v1202_v47, 2 }
 0x2ad   : > { %v4761_v57 = vpop.f32.mrb[65].mxu0  ;;  %v3601_v58 = vmax.f32 %v3565_v31, %v3583_v27  ;;  %v3584_v62 = vmul.f32 0.2, %v3566_v41  ;;  %v5041_v4 = vadd.f32 %v3486_v60, %v2180_v8 }
 0x2ae   : > { %v2183_v40 = vpop.f32.mrb[66].mxu0 }
 0x2af   : > { %v4762_v61 = vpop.f32.mrb[67].mxu0  ;;  %v3709_v5 = vsel %vm6344_vm5, %v3601_v58, 0.0  ;;  %v3602_v1 = vmax.f32 %v3566_v41, %v3584_v62  ;;  %v3541_v32 = vmul.f32 %v5041_v4, %v7300_v17  ;;  %v5042_v55 = vadd.f32 %v3489_v44, %v2183_v40  ;;  %v3494_v18 = vpop.f32.mrb[32].mxu1 }
 0x2b0   : > { %v3726_v48 = vadd.f32 %v3725_v39, %v3709_v5  ;;  %v5025_v38 = vpop.f32.mrb[33].mxu1 }
 0x2b1   : > { %v4308_v24 = vpack.c.bf16 %v3602_v1, %v3601_v58  ;;  %v3710_v10 = vsel %vm6348_vm14, %v3602_v1, 0.0  ;;  %v3567_v23 = vadd.f32 %v7305_v56, %v3541_v32  ;;  %v3542_v0 = vmul.f32 %v5042_v55, %v7300_v17  ;;  %v3497_v49 = vpop.f32.mrb[34].mxu1 }
 0x2b2   : > { %v3727_v12 = vadd.f32 %v3726_v48, %v3710_v10  ;;  %v5026_v50 = vpop.f32.mrb[35].mxu1 }
 0x2b3   : > { %4334 = vst [vmem:[%s6370_s13 + $0x78] sm:$0xff] %v4308_v24   ;;  %v3585_v14 = vmul.f32 0.2, %v3567_v23  ;;  %v3568_v33 = vadd.f32 %v7305_v56, %v3542_v0 }
 0x2b4   : > { %v2188_v34 = vpop.f32.mrb[68].mxu0 }
 0x2b5   : > { %v4765_v7 = vpop.f32.mrb[69].mxu0  ;;  %v3603_v28 = vmax.f32 %v3567_v23, %v3585_v14  ;;  %v3586_v6 = vmul.f32 0.2, %v3568_v33  ;;  %v5043_v45 = vadd.f32 %v3494_v18, %v2188_v34 }
 0x2b6   : > { %v2191_v46 = vpop.f32.mrb[70].mxu0 }
 0x2b7   : > { %v4766_v59 = vpop.f32.mrb[71].mxu0  ;;  %v3711_v25 = vsel %vm6352_vm1, %v3603_v28, 0.0  ;;  %v3604_v11 = vmax.f32 %v3568_v33, %v3586_v6  ;;  %v3543_v63 = vmul.f32 %v5043_v45, %v7300_v17  ;;  %v5044_v26 = vadd.f32 %v3497_v49, %v2191_v46 }
 0x2b8   : > { %v3728_v15 = vadd.f32 %v3727_v12, %v3711_v25 }
 0x2b9   : > { %v4313_v35 = vpack.c.bf16 %v3604_v11, %v3603_v28  ;;  %v3712_v43 = vsel %vm7649_vm13, %v3604_v11, 0.0  ;;  %v3569_v20 = vadd.f32 %v7305_v56, %v3543_v63  ;;  %v3544_v37 = vmul.f32 %v5044_v26, %v7300_v17 }
 0x2ba   : > { %v3729_v51 = vadd.f32 %v3728_v15, %v3712_v43 }
 0x2bb   : > { %4335 = vst [vmem:[%s6370_s13 + $0x80] sm:$0xff] %v4313_v35   ;;  %v3587_v3 = vmul.f32 0.2, %v3569_v20  ;;  %v3570_v16 = vadd.f32 %v7305_v56, %v3544_v37 }
 0x2bd   : > { %v3605_v52 = vmax.f32 %v3569_v20, %v3587_v3  ;;  %v3588_v21 = vmul.f32 0.2, %v3570_v16 }
 0x2bf   : > { %v3713_v17 = vsel %vm6361_vm10, %v3605_v52, 0.0  ;;  %v3606_v30 = vmax.f32 %v3570_v16, %v3588_v21 }
 0x2c0   : > { %v3730_v36 = vadd.f32 %v3729_v51, %v3713_v17 }
 0x2c1   : > { %v4318_v56 = vpack.c.bf16 %v3606_v30, %v3605_v52  ;;  %v3714_v19 = vsel %vm7650_vm6, %v3606_v30, 0.0 }
 0x2c2   : > { %v3731_v9 = vadd.f32 %v3730_v36, %v3714_v19 }
 0x2c3   : > { %4336 = vst [vmem:[%s6370_s13 + $0x88] sm:$0xff] %v4318_v56  }
 0x2c4   : > { %v3732_v42 = vrot.slane %v3731_v9, 4 }
 0x2c5   : > { %5589 = shalt.err (!%p5586_p4)
}
 0x2c6   : > { %s5590_s13 = scalar_lea.hbm %s7397_s20, 2304  ;;  %s5594_s11 = scalar_lea.hbm %s7505_s5, 9216 }
 0x2c7   : > { %p5591_p2 = scmp.ne.s32.totalorder %s7397_s20, %s5590_s13  ;;  %p5595_p8 = scmp.lt.u32.totalorder %s7397_s20, %s7505_s5 }
 0x2c8   : > { %p5596_p9 = scmp.lt.u32.totalorder %s5594_s11, %s5590_s13  ;;  %p5598_p11 = scmp.lt.u32.totalorder %s5590_s13, %s7397_s20 }
 0x2c9   : > { %p5592_p5 = pnand %p5591_p2, %p5843_p3 }
 0x2ca   : > { %p5597_p10 = por %p5596_p9, %p5595_p8 }
 0x2cb   : > { %p5593_p6 = pneg %p5592_p5 }
 0x2cc   : > { %p5599_p0 = por %p5598_p11, %p5597_p10 }
 0x2ce   : > { %p5600_p1 = pnand %p5599_p0, %p5593_p6 }
 0x2d0   : > { %5603 = shalt.err (!%p5600_p1)
}
 0x2d1   : > { %s5732_s1 = smov 64   ;;  %s5733_s0 = smov 4   ;;  %v3733_v54 = vadd.f32 %v3732_v42, %v3731_v9  ;;  %v1204_v31 = vadd.f32 %v1203_v22, %v1202_v47  ;;  %v3739_v57 = vld [vmem:[%s6374_s19] sm:$0x1] }
 0x2d2   : > { %5338 = dma.vmem_to_hbm [thread:$0]  (%p5843_p3), %s7390_s10, 2304, %s7397_s20, %s7402_s12, %s5732_s1, %s5732_s1, %s5733_s0  }
 0x2d3   : > { %v3734_v53 = vrot.slane %v3733_v54, 2  ;;  %v1205_v39 = vrot.slane %v1204_v31, 1  ;;  %s4191_s27 = sshll.u32 %s5714_s28, 4  ;;  %s3778_s13 = sshll.u32 %s6374_s19, 4  ;;  %s7434_s13 = int_to_ptr.vmem [resolvable:$true] %s3778_s13 }
 0x2d4   : > { %s7432_s15 = scalar_lea.hbm %s7506_s6, %s4191_s27  ;;  %s7652_s10 = sand.u32 1, %s5690_s22  }
 0x2d5   : > { %v3735_v27 = vadd.f32 %v3734_v53, %v3733_v54  ;;  %v1206_v8 = vadd.f32 %v1205_v39, %v1204_v31  ;;  %s3748_s20 = scalar_lea.sflag [#allocation5], %s7652_s10  ;;  %s5604_s12 = scalar_lea.vmem %s7434_s13, 16 }
 0x2d6   : > { %p5605_p3 = scmp.ne.s32.totalorder %s7434_s13, %s5604_s12  ;;  %s5734_s28 = smov [#allocation4]  }
 0x2d7   : > { %v3736_v41 = vrot.slane %v3735_v27, 1  ;;  %s5608_s11 = sshll.u32 %s5734_s28, 4  ;;  %s5609_s11 = int_to_ptr.vmem [resolvable:$false] %s5608_s11 }
 0x2d8   : > { %p5606_p4 = pnand %p5605_p3, %p5870_p12  ;;  %s5610_s16 = scalar_lea.vmem %s5609_s11, 32 }
 0x2d9   : > { %v3737_v60 = vadd.f32 %v3736_v41, %v3735_v27  ;;  %p5611_p5 = scmp.lt.s32.totalorder %s7434_s13, %s5609_s11  ;;  %p5612_p6 = scmp.lt.s32.totalorder %s5610_s16, %s5604_s12 }
 0x2da   : > { %p5607_p2 = pneg %p5606_p4 }
 0x2db   : > { %v3738_v58 = vadd.f32 %v3737_v60, %v1206_v8  ;;  %p5613_p8 = por %p5612_p6, %p5611_p5 }
 0x2dd   : > { %v3740_v62 = vadd.f32 %v3739_v57, %v3738_v58  ;;  %p5614_p9 = pnand %p5613_p8, %p5607_p2 }
 0x2df   : > { %3741 = vst [vmem:[%s6374_s19] sm:$0x1] %v3740_v62 }
 0x2e0   : > { %5617 = shalt.err (!%p5614_p9)
}
 0x2e1   : > { %s5618_s19 = scalar_lea.hbm %s7432_s15, 16  ;;  %s5622_s0 = scalar_lea.hbm %s7506_s6, 32 }
 0x2e2   : > { %p5619_p10 = scmp.ne.s32.totalorder %s7432_s15, %s5618_s19  ;;  %p5623_p1 = scmp.lt.u32.totalorder %s7432_s15, %s7506_s6 }
 0x2e3   : > { %p5624_p3 = scmp.lt.u32.totalorder %s5622_s0, %s5618_s19  ;;  %p5626_p2 = scmp.lt.u32.totalorder %s5618_s19, %s7432_s15 }
 0x2e4   : > { %p5620_p11 = pnand %p5619_p10, %p5870_p12 }
 0x2e5   : > { %p5625_p4 = por %p5624_p3, %p5623_p1 }
 0x2e6   : > { %p5621_p0 = pneg %p5620_p11 }
 0x2e7   : > { %p5627_p5 = por %p5626_p2, %p5625_p4 }
 0x2e9   : > { %p5628_p6 = pnand %p5627_p5, %p5621_p0 }
 0x2eb   : > { %5631 = shalt.err (!%p5628_p6)
}
 0x2ec   : > { %5339 = dma.vmem_to_hbm [thread:$0]  (%p5870_p12), %s7434_s13, 16, %s7432_s15, %s3748_s20  }
 0x2ed PF: > { %p5349_p8 = scmp.ge.s32.totalorder %s5726_s7, 2  ;;  %s3790_s14 = sand.u32 1, %s5698_s24  }
 0x2ee   : > { %s3791_s10 = scalar_lea.sflag [#allocation3], %s3790_s14 }
 0x2ef   : > { %p5343_p9 = pnand %p5349_p8, %p5858_p7 }
 0x2f1   : > { %5677 = dma.done.wait (!%p5343_p9), %s3791_s10, 2304  }
 0x2f2   : > { %5679 = vsyncadd (!%p5343_p9), %s3791_s10, 4294964992  ;;  %s3799_s12 = sand.u32 1, %s5686_s21   ;;  %p5346_p10 = pnand %p5349_p8, %p5882_p13 }
 0x2f3   : > { %s3800_s8 = scalar_lea.sflag [#allocation5], %s3799_s12 }
 0x2f4   : > { %5681 = dma.done.wait (!%p5346_p10), %s3800_s8, 16  }
 0x2f5   : > { %5683 = vsyncadd (!%p5346_p10), %s3800_s8, 4294967280  ;;  %s23_s7 = sadd.s32 1, %s5726_s7   ;;  %s7653_s18 = sld [smem:[#allocation12_spill]] }
 0x2f6   : > { %p20_p12 = scmp.ge.s32.totalorder %s23_s7, 6   ;;  %s7654_s27 = sld [smem:[#allocation8_spill]] }
 0x2f7   : > { %s7655_s28 = sld [smem:[#allocation9_spill]]  ;;  %s7656_s29 = sld [smem:[#allocation10_spill]] }
 0x2f8   : > { %s7657_s30 = sld [smem:[#allocation11_spill]]  ;;  %s7658_s21 = smov %s5690_s22 }
 0x2f9   : > { %s7659_s22 = smov %s5694_s23  ;;  %s7660_s23 = smov %s5875_s9 }
 0x2fa   : > { %s7661_s24 = smov %s5702_s25  ;;  %s7662_s25 = smov %s5706_s26 }
 0x2fb   : > { %s7663_s26 = smov %s7653_s18  ;;  %22 = sbr.rel (!%p20_p12) target bundleno = 12 (0xc), region = 106 }
 0x302   :  { %3804 = vsyncpa [#allocation3], 1 }
 0x303   :  { %3806 = vsyncpa [#allocation3 + $0x1], 1 }
 0x304   :  { %3807 = vsyncpa [#allocation5], 1 }
 0x305   :  { %3809 = vsyncpa [#allocation5 + $0x1], 1 }

</bundles_post_ra>
